<compile_context>
chip_gen: v5e
topology: v5e:2x2
jax: 0.10.0
libtpu: 0.0.40
codegen_flags: <defaults>
</compile_context>

<pallas_src>
import functools

import jax
import jax.numpy as jnp
from jax.experimental import pallas as pl
from jax.experimental.pallas import tpu as pltpu

# ----------------------------- model config (small) --------------------------
B = 2            # batch
S = 8            # sequence length
H = 128          # hidden size, padded to the 128-lane vreg width (real: 768)
N_HEADS = 4      # heads (real: 12)
D_HEAD = H // N_HEADS
FFN = 256        # FFN inner dim (real: 3072)
N_LAYERS = 2     # layers (real: 12)
VOCAB = 100
NUM_LABELS = 7   # len(label_cols)
C_PAD = 128      # classifier output padded to full lane width
S_PAD = 128      # attention-bias row padded to full lane width
LN_EPS = 1e-5


# ----------------------------- fused whole-model kernel ----------------------
def _fused_kernel(h0_ref, bias_ref,
                  wqkv_ref, bqkv_ref, wo_ref, bo_ref,
                  ln1g_ref, ln1b_ref, w1_ref, b1_ref, w2_ref, b2_ref,
                  ln2g_ref, ln2b_ref,
                  clsw_ref, clsb_ref, y_ref,
                  logits_ref, bce_ref,
                  h_scr,
                  *, n_heads, d_head, num_labels):
    """Grid = (batch, layer). One step = one transformer layer for one batch row.
    Hidden state stays resident in VMEM scratch across the layer axis; the
    mean-pool + classifier + BCE terms are fused into the last layer step."""
    layer = pl.program_id(1)
    n_layers = pl.num_programs(1)
    s, hid = h_scr.shape

    # ---- load hidden state (embeddings) on the first layer step -------------
    @pl.when(layer == 0)
    def _():
        h_scr[...] = h0_ref[0].astype(jnp.float32)

    x = h_scr[...]                                   # [S, H] f32
    bias_row = bias_ref[0][:, :s]                    # [1, S] additive mask bias

    # ---- fused QKV projection: one [H, 3H] bf16 matmul, f32 accumulation ----
    # (softmax 1/sqrt(d_head) scale is pre-folded into the q weight columns)
    qkv = jnp.dot(x.astype(jnp.bfloat16), wqkv_ref[0],
                  preferred_element_type=jnp.float32) + bqkv_ref[0]
    qkv = qkv.astype(jnp.bfloat16)                   # single cast for all heads

    # ---- multi-head attention; head contexts concatenated so the output
    # ---- projection is ONE lane-aligned K=H MXU push (not 4 K=32 dots) ------
    ctx_heads = []
    for hh in range(n_heads):                        # static unrolled head loop
        lo = hh * d_head
        qh = qkv[:, lo:lo + d_head]
        kh = qkv[:, hid + lo:hid + lo + d_head]
        vh = qkv[:, 2 * hid + lo:2 * hid + lo + d_head]
        sc = jnp.einsum('qd,kd->qk', qh, kh,
                        preferred_element_type=jnp.float32)         # [S, S]
        sc = sc + bias_row
        sc = sc - jnp.max(sc, axis=-1, keepdims=True)
        p = jnp.exp(sc)
        p = p * pl.reciprocal(jnp.sum(p, axis=-1, keepdims=True), approx=True)
        ctx_heads.append(jnp.einsum('qk,kd->qd', p.astype(jnp.bfloat16), vh,
                                    preferred_element_type=jnp.float32))
    ctx = jnp.concatenate(ctx_heads, axis=-1)        # [S, H] head merge
    attn = jnp.dot(ctx.astype(jnp.bfloat16), wo_ref[0],
                   preferred_element_type=jnp.float32) + bo_ref[0]

    # ---- residual + LayerNorm 1 (f32) ----------------------------------------
    h1 = attn + x
    mu = jnp.mean(h1, axis=-1, keepdims=True)
    var = jnp.mean(jnp.square(h1 - mu), axis=-1, keepdims=True)
    h1 = (h1 - mu) * jax.lax.rsqrt(var + LN_EPS)
    h1 = h1 * ln1g_ref[0] + ln1b_ref[0]

    # ---- GELU FFN (bf16 MXU operands, f32 elementwise) -----------------------
    # XLNet's gelu is the tanh approximation, which matches jax.nn.gelu default.
    ff = jnp.dot(h1.astype(jnp.bfloat16), w1_ref[0],
                 preferred_element_type=jnp.float32) + b1_ref[0]
    ff = jax.nn.gelu(ff)
    ff = jnp.dot(ff.astype(jnp.bfloat16), w2_ref[0],
                 preferred_element_type=jnp.float32) + b2_ref[0]

    # ---- residual + LayerNorm 2 (f32) -----------------------------------------
    h2 = ff + h1
    mu = jnp.mean(h2, axis=-1, keepdims=True)
    var = jnp.mean(jnp.square(h2 - mu), axis=-1, keepdims=True)
    h2 = (h2 - mu) * jax.lax.rsqrt(var + LN_EPS)
    h2 = h2 * ln2g_ref[0] + ln2b_ref[0]

    h_scr[...] = h2                                  # stays in VMEM between layers

    # ---- fused mean-pool + classifier (+ BCEWithLogits terms) on last layer --
    @pl.when(layer == n_layers - 1)
    def _():
        pooled = jnp.mean(h2, axis=0, keepdims=True)                  # [1, H]
        z = jnp.dot(pooled.astype(jnp.bfloat16),
                    clsw_ref[...].astype(jnp.bfloat16),
                    preferred_element_type=jnp.float32) + clsb_ref[...]  # [1, C_PAD]
        logits_ref[...] = z.reshape(logits_ref.shape)
        # numerically-stable BCEWithLogits: max(z,0) - z*y + log1p(exp(-|z|))
        y = y_ref[0]
        per = jnp.maximum(z, 0.0) - z * y + jnp.log1p(jnp.exp(-jnp.abs(z)))
        lane = jax.lax.broadcasted_iota(jnp.int32, per.shape, 1)
        per = jnp.where(lane < num_labels, per, 0.0)                  # mask pad labels
        bce_ref[...] = per.reshape(bce_ref.shape)


def _fused_forward(h0, bias_pad, labels_pad, p):
    bsz, s, hid = h0.shape
    n_layers = p["wqkv"].shape[0]
    kernel = functools.partial(_fused_kernel, n_heads=N_HEADS, d_head=D_HEAD,
                               num_labels=NUM_LABELS)

    def per_batch(shape):
        n = len(shape)
        return pl.BlockSpec((1,) + tuple(shape[1:]),
                            lambda b, l, n=n: (b,) + (0,) * (n - 1))

    def per_layer(shape):
        n = len(shape)
        return pl.BlockSpec((1,) + tuple(shape[1:]),
                            lambda b, l, n=n: (l,) + (0,) * (n - 1))

    def shared(shape):
        n = len(shape)
        return pl.BlockSpec(tuple(shape), lambda b, l, n=n: (0,) * n)

    return pl.pallas_call(
        kernel,
        out_shape=(jax.ShapeDtypeStruct((bsz, 1, C_PAD), jnp.float32),   # logits (padded)
                   jax.ShapeDtypeStruct((bsz, 1, C_PAD), jnp.float32)),  # per-label BCE terms
        grid=(bsz, n_layers),
        in_specs=[
            per_batch(h0.shape),                   # embeddings (bf16), read at layer 0
            per_batch(bias_pad.shape),             # additive attention bias (lane-padded)
            per_layer(p["wqkv"].shape),            # [L, H, 3H] fused QKV (bf16)
            per_layer(p["bqkv"].shape),
            per_layer(p["wo"].shape),              # [L, H, H] (bf16)
            per_layer(p["bo"].shape),
            per_layer(p["ln1_g"].shape), per_layer(p["ln1_b"].shape),
            per_layer(p["w1"].shape), per_layer(p["b1"].shape),
            per_layer(p["w2"].shape), per_layer(p["b2"].shape),
            per_layer(p["ln2_g"].shape), per_layer(p["ln2_b"].shape),
            shared(p["cls_w"].shape),              # [H, C_PAD]
            shared(p["cls_b"].shape),              # [1, C_PAD]
            per_batch(labels_pad.shape),           # [B, 1, C_PAD]
        ],
        out_specs=(per_batch((bsz, 1, C_PAD)),
                   per_batch((bsz, 1, C_PAD))),
        scratch_shapes=[pltpu.VMEM((s, hid), jnp.float32)],  # VMEM-resident hidden state
        compiler_params=pltpu.CompilerParams(
            # batch axis -> both TensorCores on v7x; layer axis is sequential.
            dimension_semantics=("parallel", "arbitrary"),
            # explicit VMEM budget; at real dims on v7x (64 MiB) re-derive the
            # tiling (pl.Buffered(1) / K-tiled grid for w1/w2) instead of this.
            vmem_limit_bytes=32 * 1024 * 1024),
    )(h0, bias_pad,
      p["wqkv"], p["bqkv"], p["wo"], p["bo"],
      p["ln1_g"], p["ln1_b"], p["w1"], p["b1"], p["w2"], p["b2"],
      p["ln2_g"], p["ln2_b"],
      p["cls_w"], p["cls_b"], labels_pad)


# ----------------------------- forward ----------------------------------------
def xlnet_multilabel_forward(params, input_ids, token_type_ids=None,
                             attention_mask=None, labels=None):
    # TODO(synk): XLNet's relative-positional two-stream attention and segment
    # embeddings are replaced by learned absolute positional embeddings +
    # standard self-attention (no clean small-scale Pallas equivalent of the
    # pretrained rel-attn machinery); dropout is omitted (inference semantics).
    bsz, s = input_ids.shape
    if attention_mask is None:
        attention_mask = jnp.ones((bsz, s), jnp.float32)
    # additive attention bias (0 valid, -1e9 pad), lane-padded to 128
    bias = (1.0 - attention_mask.astype(jnp.float32)) * (-1e9)
    bias_pad = jnp.zeros((bsz, 1, S_PAD), jnp.float32).at[:, 0, :s].set(bias)

    # embedding lookup + positional embedding (XLA glue); enters kernel as bf16
    h0 = (jnp.take(params["word_emb"], input_ids, axis=0)
          + params["pos_emb"][None, :s, :]).astype(jnp.bfloat16)

    labels_pad = jnp.zeros((bsz, 1, C_PAD), jnp.float32)
    if labels is not None:
        labels_pad = labels_pad.at[:, 0, :NUM_LABELS].set(
            labels.reshape(bsz, NUM_LABELS).astype(jnp.float32))

    logits_pad, bce_terms = _fused_forward(h0, bias_pad, labels_pad, params)

    if labels is not None:
        # BCEWithLogitsLoss(mean); padded label lanes are already zeroed in-kernel
        return jnp.sum(bce_terms) / float(bsz * NUM_LABELS)
    return logits_pad[:, 0, :NUM_LABELS]


# ----------------------------- deterministic params --------------------------
def init_params(key):
    ks = jax.random.split(key, 9)

    def nrm(k, shape, std=0.02):
        return std * jax.random.normal(k, shape, dtype=jnp.float32)

    # classifier: xavier_normal_ on a (num_labels, H) torch weight, lane-padded
    cls_std = (2.0 / (H + NUM_LABELS)) ** 0.5
    cls_w = jnp.zeros((H, C_PAD), jnp.float32).at[:, :NUM_LABELS].set(
        nrm(ks[0], (H, NUM_LABELS), std=cls_std))

    # fused QKV weight [L, H, 3H], columns [q | k | v]; the softmax 1/sqrt(d_head)
    # scale is folded into the q columns (free at init, saves per-layer VPU muls;
    # q bias is zero so no bias rescale needed).
    scale = 1.0 / (D_HEAD ** 0.5)
    wq = nrm(ks[3], (N_LAYERS, H, H)) * scale
    wk = nrm(ks[4], (N_LAYERS, H, H))
    wv = nrm(ks[5], (N_LAYERS, H, H))
    wqkv = jnp.concatenate([wq, wk, wv], axis=-1).astype(jnp.bfloat16)

    return {
        "word_emb": nrm(ks[1], (VOCAB, H)),
        "pos_emb": nrm(ks[2], (S, H)),
        "cls_w": cls_w,                               # padded to 128 lanes (f32)
        "cls_b": jnp.zeros((1, C_PAD), jnp.float32),
        # per-layer weights stacked on a leading layer axis -> single pallas_call grid
        "wqkv": wqkv,
        "bqkv": jnp.zeros((N_LAYERS, 1, 3 * H), jnp.float32),
        "wo": nrm(ks[6], (N_LAYERS, H, H)).astype(jnp.bfloat16),
        "bo": jnp.zeros((N_LAYERS, 1, H), jnp.float32),
        "ln1_g": jnp.ones((N_LAYERS, 1, H), jnp.float32),
        "ln1_b": jnp.zeros((N_LAYERS, 1, H), jnp.float32),
        "w1": nrm(ks[7], (N_LAYERS, H, FFN)).astype(jnp.bfloat16),
        "b1": jnp.zeros((N_LAYERS, 1, FFN), jnp.float32),
        "w2": nrm(ks[8], (N_LAYERS, FFN, H)).astype(jnp.bfloat16),
        "b2": jnp.zeros((N_LAYERS, 1, H), jnp.float32),
        "ln2_g": jnp.ones((N_LAYERS, 1, H), jnp.float32),
        "ln2_b": jnp.zeros((N_LAYERS, 1, H), jnp.float32),
    }


# ----------------------------- main ------------------------------------------
if __name__ == "__main__":
    root = jax.random.PRNGKey(0)
    k_params, k_ids, k_labels = jax.random.split(root, 3)

    params = init_params(k_params)
    input_ids = jax.random.randint(k_ids, (B, S), 0, VOCAB, dtype=jnp.int32)
    attention_mask = jnp.ones((B, S), jnp.float32)
    labels = jax.random.bernoulli(k_labels, 0.3, (B, NUM_LABELS)).astype(jnp.float32)

    # inference path (labels=None) -> logits [B, NUM_LABELS]
    logits = xlnet_multilabel_forward(params, input_ids,
                                      attention_mask=attention_mask)
    logits = jax.block_until_ready(logits)
    assert logits.shape == (B, NUM_LABELS), logits.shape
    assert bool(jnp.all(jnp.isfinite(logits)))

    # training path (labels given) -> scalar BCEWithLogits loss
    loss = xlnet_multilabel_forward(params, input_ids,
                                    attention_mask=attention_mask,
                                    labels=labels)
    loss = jax.block_until_ready(loss)
    assert loss.shape == () and bool(jnp.isfinite(loss))

    print("KERNEL_OK")
</pallas_src>

<mosaic_0001>
module attributes {stable_mosaic.version = 11 : i64} {
  func.func @_fused_kernel(%arg0: i32, %arg1: i32, %arg2: memref<1x8x128xbf16, #tpu.memory_space<vmem>>, %arg3: memref<1x1x128xf32, #tpu.memory_space<vmem>>, %arg4: memref<1x128x384xbf16, #tpu.memory_space<vmem>>, %arg5: memref<1x1x384xf32, #tpu.memory_space<vmem>>, %arg6: memref<1x128x128xbf16, #tpu.memory_space<vmem>>, %arg7: memref<1x1x128xf32, #tpu.memory_space<vmem>>, %arg8: memref<1x1x128xf32, #tpu.memory_space<vmem>>, %arg9: memref<1x1x128xf32, #tpu.memory_space<vmem>>, %arg10: memref<1x128x256xbf16, #tpu.memory_space<vmem>>, %arg11: memref<1x1x256xf32, #tpu.memory_space<vmem>>, %arg12: memref<1x256x128xbf16, #tpu.memory_space<vmem>>, %arg13: memref<1x1x128xf32, #tpu.memory_space<vmem>>, %arg14: memref<1x1x128xf32, #tpu.memory_space<vmem>>, %arg15: memref<1x1x128xf32, #tpu.memory_space<vmem>>, %arg16: memref<128x128xf32, #tpu.memory_space<vmem>>, %arg17: memref<1x128xf32, #tpu.memory_space<vmem>>, %arg18: memref<1x1x128xf32, #tpu.memory_space<vmem>>, %arg19: memref<1x1x128xf32, #tpu.memory_space<vmem>>, %arg20: memref<1x1x128xf32, #tpu.memory_space<vmem>>, %arg21: memref<8x128xf32, #tpu.memory_space<vmem>>) attributes {dimension_semantics = [#tpu.dimension_semantics<parallel>, #tpu.dimension_semantics<arbitrary>], iteration_bounds = array<i64: 2, 2>, scalar_prefetch = 0 : i64, scratch_operands = 1 : i64, tpu.core_type = #tpu.core_type<tc>, window_params = [{transform_indices = @transform_0, window_bounds = array<i64: 1, 8, 128>}, {transform_indices = @transform_1, window_bounds = array<i64: 1, 1, 128>}, {transform_indices = @transform_2, window_bounds = array<i64: 1, 128, 384>}, {transform_indices = @transform_3, window_bounds = array<i64: 1, 1, 384>}, {transform_indices = @transform_4, window_bounds = array<i64: 1, 128, 128>}, {transform_indices = @transform_5, window_bounds = array<i64: 1, 1, 128>}, {transform_indices = @transform_6, window_bounds = array<i64: 1, 1, 128>}, {transform_indices = @transform_7, window_bounds = array<i64: 1, 1, 128>}, {transform_indices = @transform_8, window_bounds = array<i64: 1, 128, 256>}, {transform_indices = @transform_9, window_bounds = array<i64: 1, 1, 256>}, {transform_indices = @transform_10, window_bounds = array<i64: 1, 256, 128>}, {transform_indices = @transform_11, window_bounds = array<i64: 1, 1, 128>}, {transform_indices = @transform_12, window_bounds = array<i64: 1, 1, 128>}, {transform_indices = @transform_13, window_bounds = array<i64: 1, 1, 128>}, {pipeline_mode = #tpu.pipeline_mode<synchronous>, transform_indices = @transform_14, window_bounds = array<i64: 128, 128>}, {pipeline_mode = #tpu.pipeline_mode<synchronous>, transform_indices = @transform_15, window_bounds = array<i64: 1, 128>}, {transform_indices = @transform_16, window_bounds = array<i64: 1, 1, 128>}, {transform_indices = @transform_17, window_bounds = array<i64: 1, 1, 128>}, {transform_indices = @transform_18, window_bounds = array<i64: 1, 1, 128>}]} {
    %c0_i32 = arith.constant 0 : i32
    %0 = arith.cmpi eq, %arg1, %c0_i32 : i32
    %1 = arith.extui %0 : i1 to i32
    %c0_i32_0 = arith.constant 0 : i32
    %2 = arith.cmpi ne, %1, %c0_i32_0 : i32
    scf.if %2 {
      %c0_77 = arith.constant 0 : index
      %c0_78 = arith.constant 0 : index
      %c0_79 = arith.constant 0 : index
      %184 = vector.load %arg2[%c0_77, %c0_78, %c0_79] : memref<1x8x128xbf16, #tpu.memory_space<vmem>>, vector<1x8x128xbf16>
      %185 = vector.shape_cast %184 : vector<1x8x128xbf16> to vector<8x128xbf16>
      %186 = arith.extf %185 : vector<8x128xbf16> to vector<8x128xf32>
      %c0_80 = arith.constant 0 : index
      %c0_81 = arith.constant 0 : index
      %187 = vector.load %arg21[%c0_80, %c0_81] : memref<8x128xf32, #tpu.memory_space<vmem>>, vector<8x128xf32>
      tpu.vector_store %arg21[%c0_80, %c0_81], %186 {strides = array<i32>} : memref<8x128xf32, #tpu.memory_space<vmem>>, vector<8x128xf32>,
    } else {
    }
    %c0 = arith.constant 0 : index
    %c0_1 = arith.constant 0 : index
    %3 = vector.load %arg21[%c0, %c0_1] : memref<8x128xf32, #tpu.memory_space<vmem>>, vector<8x128xf32>
    %c0_2 = arith.constant 0 : index
    %c0_3 = arith.constant 0 : index
    %c0_4 = arith.constant 0 : index
    %4 = vector.load %arg3[%c0_2, %c0_3, %c0_4] : memref<1x1x128xf32, #tpu.memory_space<vmem>>, vector<1x1x128xf32>
    %5 = vector.shape_cast %4 : vector<1x1x128xf32> to vector<1x128xf32>
    %6 = vector.extract_strided_slice %5 {offsets = [0, 0], sizes = [1, 8], strides = [1, 1]} : vector<1x128xf32> to vector<1x8xf32>
    %7 = arith.truncf %3 : vector<8x128xf32> to vector<8x128xbf16>
    %c0_5 = arith.constant 0 : index
    %c0_6 = arith.constant 0 : index
    %c0_7 = arith.constant 0 : index
    %8 = vector.load %arg4[%c0_5, %c0_6, %c0_7] : memref<1x128x384xbf16, #tpu.memory_space<vmem>>, vector<1x128x384xbf16>
    %9 = vector.shape_cast %8 : vector<1x128x384xbf16> to vector<128x384xbf16>
    %cst = arith.constant dense<0.000000e+00> : vector<8x384xf32>
    %10 = tpu.matmul %7, %9, %cst {dimension_numbers = #tpu.dot_dimension_numbers<[1], [0], [0], [1], [0, 0, 1, 1], [], []>} : vector<8x128xbf16>, vector<128x384xbf16>, vector<8x384xf32> -> vector<8x384xf32>
    %c0_8 = arith.constant 0 : index
    %c0_9 = arith.constant 0 : index
    %c0_10 = arith.constant 0 : index
    %11 = vector.load %arg5[%c0_8, %c0_9, %c0_10] : memref<1x1x384xf32, #tpu.memory_space<vmem>>, vector<1x1x384xf32>
    %12 = vector.shape_cast %11 : vector<1x1x384xf32> to vector<1x384xf32>
    %13 = vector.broadcast %12 : vector<1x384xf32> to vector<8x384xf32>
    %14 = arith.addf %10, %13 : vector<8x384xf32>
    %15 = arith.truncf %14 : vector<8x384xf32> to vector<8x384xbf16>
    %16 = vector.extract_strided_slice %15 {offsets = [0, 0], sizes = [8, 32], strides = [1, 1]} : vector<8x384xbf16> to vector<8x32xbf16>
    %17 = vector.extract_strided_slice %15 {offsets = [0, 128], sizes = [8, 32], strides = [1, 1]} : vector<8x384xbf16> to vector<8x32xbf16>
    %18 = vector.extract_strided_slice %15 {offsets = [0, 256], sizes = [8, 32], strides = [1, 1]} : vector<8x384xbf16> to vector<8x32xbf16>
    "tpu.trace_start"() <{level = 10 : i32, message = "qd,kd->qk"}> : () -> ()
    %cst_11 = arith.constant dense<0.000000e+00> : vector<8x8xf32>
    %19 = tpu.matmul %16, %17, %cst_11 {dimension_numbers = #tpu.dot_dimension_numbers<[1], [1], [0], [0], [0, 0, 1, 0], [], []>} : vector<8x32xbf16>, vector<8x32xbf16>, vector<8x8xf32> -> vector<8x8xf32>
    "tpu.trace_stop"() : () -> ()
    %20 = vector.broadcast %6 : vector<1x8xf32> to vector<8x8xf32>
    %21 = arith.addf %19, %20 : vector<8x8xf32>
    %cst_12 = arith.constant dense<0xFF800000> : vector<8xf32>
    %22 = vector.multi_reduction <maximumf>, %21, %cst_12 [1] : vector<8x8xf32> to vector<8xf32>
    %23 = vector.shape_cast %22 : vector<8xf32> to vector<8x1xf32>
    %24 = vector.broadcast %23 : vector<8x1xf32> to vector<8x8xf32>
    %25 = arith.subf %21, %24 : vector<8x8xf32>
    %26 = math.exp %25 : vector<8x8xf32>
    %cst_13 = arith.constant dense<0.000000e+00> : vector<8xf32>
    %27 = vector.multi_reduction <add>, %26, %cst_13 [1] : vector<8x8xf32> to vector<8xf32>
    %28 = vector.shape_cast %27 : vector<8xf32> to vector<8x1xf32>
    %29 = tpu.reciprocal %28 {approx = true} : vector<8x1xf32> -> vector<8x1xf32>
    %30 = vector.broadcast %29 : vector<8x1xf32> to vector<8x8xf32>
    %31 = arith.mulf %26, %30 : vector<8x8xf32>
    %32 = arith.truncf %31 : vector<8x8xf32> to vector<8x8xbf16>
    "tpu.trace_start"() <{level = 10 : i32, message = "qk,kd->qd"}> : () -> ()
    %cst_14 = arith.constant dense<0.000000e+00> : vector<8x32xf32>
    %33 = tpu.matmul %32, %18, %cst_14 {dimension_numbers = #tpu.dot_dimension_numbers<[1], [0], [0], [1], [0, 0, 1, 1], [], []>} : vector<8x8xbf16>, vector<8x32xbf16>, vector<8x32xf32> -> vector<8x32xf32>
    "tpu.trace_stop"() : () -> ()
    %34 = vector.extract_strided_slice %15 {offsets = [0, 32], sizes = [8, 32], strides = [1, 1]} : vector<8x384xbf16> to vector<8x32xbf16>
    %35 = vector.extract_strided_slice %15 {offsets = [0, 160], sizes = [8, 32], strides = [1, 1]} : vector<8x384xbf16> to vector<8x32xbf16>
    %36 = vector.extract_strided_slice %15 {offsets = [0, 288], sizes = [8, 32], strides = [1, 1]} : vector<8x384xbf16> to vector<8x32xbf16>
    "tpu.trace_start"() <{level = 10 : i32, message = "qd,kd->qk"}> : () -> ()
    %cst_15 = arith.constant dense<0.000000e+00> : vector<8x8xf32>
    %37 = tpu.matmul %34, %35, %cst_15 {dimension_numbers = #tpu.dot_dimension_numbers<[1], [1], [0], [0], [0, 0, 1, 0], [], []>} : vector<8x32xbf16>, vector<8x32xbf16>, vector<8x8xf32> -> vector<8x8xf32>
    "tpu.trace_stop"() : () -> ()
    %38 = vector.broadcast %6 : vector<1x8xf32> to vector<8x8xf32>
    %39 = arith.addf %37, %38 : vector<8x8xf32>
    %cst_16 = arith.constant dense<0xFF800000> : vector<8xf32>
    %40 = vector.multi_reduction <maximumf>, %39, %cst_16 [1] : vector<8x8xf32> to vector<8xf32>
    %41 = vector.shape_cast %40 : vector<8xf32> to vector<8x1xf32>
    %42 = vector.broadcast %41 : vector<8x1xf32> to vector<8x8xf32>
    %43 = arith.subf %39, %42 : vector<8x8xf32>
    %44 = math.exp %43 : vector<8x8xf32>
    %cst_17 = arith.constant dense<0.000000e+00> : vector<8xf32>
    %45 = vector.multi_reduction <add>, %44, %cst_17 [1] : vector<8x8xf32> to vector<8xf32>
    %46 = vector.shape_cast %45 : vector<8xf32> to vector<8x1xf32>
    %47 = tpu.reciprocal %46 {approx = true} : vector<8x1xf32> -> vector<8x1xf32>
    %48 = vector.broadcast %47 : vector<8x1xf32> to vector<8x8xf32>
    %49 = arith.mulf %44, %48 : vector<8x8xf32>
    %50 = arith.truncf %49 : vector<8x8xf32> to vector<8x8xbf16>
    "tpu.trace_start"() <{level = 10 : i32, message = "qk,kd->qd"}> : () -> ()
    %cst_18 = arith.constant dense<0.000000e+00> : vector<8x32xf32>
    %51 = tpu.matmul %50, %36, %cst_18 {dimension_numbers = #tpu.dot_dimension_numbers<[1], [0], [0], [1], [0, 0, 1, 1], [], []>} : vector<8x8xbf16>, vector<8x32xbf16>, vector<8x32xf32> -> vector<8x32xf32>
    "tpu.trace_stop"() : () -> ()
    %52 = vector.extract_strided_slice %15 {offsets = [0, 64], sizes = [8, 32], strides = [1, 1]} : vector<8x384xbf16> to vector<8x32xbf16>
    %53 = vector.extract_strided_slice %15 {offsets = [0, 192], sizes = [8, 32], strides = [1, 1]} : vector<8x384xbf16> to vector<8x32xbf16>
    %54 = vector.extract_strided_slice %15 {offsets = [0, 320], sizes = [8, 32], strides = [1, 1]} : vector<8x384xbf16> to vector<8x32xbf16>
    "tpu.trace_start"() <{level = 10 : i32, message = "qd,kd->qk"}> : () -> ()
    %cst_19 = arith.constant dense<0.000000e+00> : vector<8x8xf32>
    %55 = tpu.matmul %52, %53, %cst_19 {dimension_numbers = #tpu.dot_dimension_numbers<[1], [1], [0], [0], [0, 0, 1, 0], [], []>} : vector<8x32xbf16>, vector<8x32xbf16>, vector<8x8xf32> -> vector<8x8xf32>
    "tpu.trace_stop"() : () -> ()
    %56 = vector.broadcast %6 : vector<1x8xf32> to vector<8x8xf32>
    %57 = arith.addf %55, %56 : vector<8x8xf32>
    %cst_20 = arith.constant dense<0xFF800000> : vector<8xf32>
    %58 = vector.multi_reduction <maximumf>, %57, %cst_20 [1] : vector<8x8xf32> to vector<8xf32>
    %59 = vector.shape_cast %58 : vector<8xf32> to vector<8x1xf32>
    %60 = vector.broadcast %59 : vector<8x1xf32> to vector<8x8xf32>
    %61 = arith.subf %57, %60 : vector<8x8xf32>
    %62 = math.exp %61 : vector<8x8xf32>
    %cst_21 = arith.constant dense<0.000000e+00> : vector<8xf32>
    %63 = vector.multi_reduction <add>, %62, %cst_21 [1] : vector<8x8xf32> to vector<8xf32>
    %64 = vector.shape_cast %63 : vector<8xf32> to vector<8x1xf32>
    %65 = tpu.reciprocal %64 {approx = true} : vector<8x1xf32> -> vector<8x1xf32>
    %66 = vector.broadcast %65 : vector<8x1xf32> to vector<8x8xf32>
    %67 = arith.mulf %62, %66 : vector<8x8xf32>
    %68 = arith.truncf %67 : vector<8x8xf32> to vector<8x8xbf16>
    "tpu.trace_start"() <{level = 10 : i32, message = "qk,kd->qd"}> : () -> ()
    %cst_22 = arith.constant dense<0.000000e+00> : vector<8x32xf32>
    %69 = tpu.matmul %68, %54, %cst_22 {dimension_numbers = #tpu.dot_dimension_numbers<[1], [0], [0], [1], [0, 0, 1, 1], [], []>} : vector<8x8xbf16>, vector<8x32xbf16>, vector<8x32xf32> -> vector<8x32xf32>
    "tpu.trace_stop"() : () -> ()
    %70 = vector.extract_strided_slice %15 {offsets = [0, 96], sizes = [8, 32], strides = [1, 1]} : vector<8x384xbf16> to vector<8x32xbf16>
    %71 = vector.extract_strided_slice %15 {offsets = [0, 224], sizes = [8, 32], strides = [1, 1]} : vector<8x384xbf16> to vector<8x32xbf16>
    %72 = vector.extract_strided_slice %15 {offsets = [0, 352], sizes = [8, 32], strides = [1, 1]} : vector<8x384xbf16> to vector<8x32xbf16>
    "tpu.trace_start"() <{level = 10 : i32, message = "qd,kd->qk"}> : () -> ()
    %cst_23 = arith.constant dense<0.000000e+00> : vector<8x8xf32>
    %73 = tpu.matmul %70, %71, %cst_23 {dimension_numbers = #tpu.dot_dimension_numbers<[1], [1], [0], [0], [0, 0, 1, 0], [], []>} : vector<8x32xbf16>, vector<8x32xbf16>, vector<8x8xf32> -> vector<8x8xf32>
    "tpu.trace_stop"() : () -> ()
    %74 = vector.broadcast %6 : vector<1x8xf32> to vector<8x8xf32>
    %75 = arith.addf %73, %74 : vector<8x8xf32>
    %cst_24 = arith.constant dense<0xFF800000> : vector<8xf32>
    %76 = vector.multi_reduction <maximumf>, %75, %cst_24 [1] : vector<8x8xf32> to vector<8xf32>
    %77 = vector.shape_cast %76 : vector<8xf32> to vector<8x1xf32>
    %78 = vector.broadcast %77 : vector<8x1xf32> to vector<8x8xf32>
    %79 = arith.subf %75, %78 : vector<8x8xf32>
    %80 = math.exp %79 : vector<8x8xf32>
    %cst_25 = arith.constant dense<0.000000e+00> : vector<8xf32>
    %81 = vector.multi_reduction <add>, %80, %cst_25 [1] : vector<8x8xf32> to vector<8xf32>
    %82 = vector.shape_cast %81 : vector<8xf32> to vector<8x1xf32>
    %83 = tpu.reciprocal %82 {approx = true} : vector<8x1xf32> -> vector<8x1xf32>
    %84 = vector.broadcast %83 : vector<8x1xf32> to vector<8x8xf32>
    %85 = arith.mulf %80, %84 : vector<8x8xf32>
    %86 = arith.truncf %85 : vector<8x8xf32> to vector<8x8xbf16>
    "tpu.trace_start"() <{level = 10 : i32, message = "qk,kd->qd"}> : () -> ()
    %cst_26 = arith.constant dense<0.000000e+00> : vector<8x32xf32>
    %87 = tpu.matmul %86, %72, %cst_26 {dimension_numbers = #tpu.dot_dimension_numbers<[1], [0], [0], [1], [0, 0, 1, 1], [], []>} : vector<8x8xbf16>, vector<8x32xbf16>, vector<8x32xf32> -> vector<8x32xf32>
    "tpu.trace_stop"() : () -> ()
    %88 = tpu.concatenate %33, %51, %69, %87 in 1 : vector<8x32xf32>, vector<8x32xf32>, vector<8x32xf32>, vector<8x32xf32> -> vector<8x128xf32>
    %89 = arith.truncf %88 : vector<8x128xf32> to vector<8x128xbf16>
    %c0_27 = arith.constant 0 : index
    %c0_28 = arith.constant 0 : index
    %c0_29 = arith.constant 0 : index
    %90 = vector.load %arg6[%c0_27, %c0_28, %c0_29] : memref<1x128x128xbf16, #tpu.memory_space<vmem>>, vector<1x128x128xbf16>
    %91 = vector.shape_cast %90 : vector<1x128x128xbf16> to vector<128x128xbf16>
    %cst_30 = arith.constant dense<0.000000e+00> : vector<8x128xf32>
    %92 = tpu.matmul %89, %91, %cst_30 {dimension_numbers = #tpu.dot_dimension_numbers<[1], [0], [0], [1], [0, 0, 1, 1], [], []>} : vector<8x128xbf16>, vector<128x128xbf16>, vector<8x128xf32> -> vector<8x128xf32>
    %c0_31 = arith.constant 0 : index
    %c0_32 = arith.constant 0 : index
    %c0_33 = arith.constant 0 : index
    %93 = vector.load %arg7[%c0_31, %c0_32, %c0_33] : memref<1x1x128xf32, #tpu.memory_space<vmem>>, vector<1x1x128xf32>
    %94 = vector.shape_cast %93 : vector<1x1x128xf32> to vector<1x128xf32>
    %95 = vector.broadcast %94 : vector<1x128xf32> to vector<8x128xf32>
    %96 = arith.addf %92, %95 : vector<8x128xf32>
    %97 = arith.addf %96, %3 : vector<8x128xf32>
    %cst_34 = arith.constant dense<0.000000e+00> : vector<8xf32>
    %98 = vector.multi_reduction <add>, %97, %cst_34 [1] : vector<8x128xf32> to vector<8xf32>
    %99 = vector.shape_cast %98 : vector<8xf32> to vector<8x1xf32>
    %cst_35 = arith.constant 1.280000e+02 : f32
    %100 = vector.broadcast %cst_35 : f32 to vector<8x1xf32>
    %101 = arith.divf %99, %100 : vector<8x1xf32>
    %102 = vector.broadcast %101 : vector<8x1xf32> to vector<8x128xf32>
    %103 = arith.subf %97, %102 : vector<8x128xf32>
    %104 = arith.mulf %103, %103 : vector<8x128xf32>
    %cst_36 = arith.constant dense<0.000000e+00> : vector<8xf32>
    %105 = vector.multi_reduction <add>, %104, %cst_36 [1] : vector<8x128xf32> to vector<8xf32>
    %106 = vector.shape_cast %105 : vector<8xf32> to vector<8x1xf32>
    %cst_37 = arith.constant 1.280000e+02 : f32
    %107 = vector.broadcast %cst_37 : f32 to vector<8x1xf32>
    %108 = arith.divf %106, %107 : vector<8x1xf32>
    %109 = vector.broadcast %101 : vector<8x1xf32> to vector<8x128xf32>
    %110 = arith.subf %97, %109 : vector<8x128xf32>
    %cst_38 = arith.constant 9.99999974E-6 : f32
    %111 = vector.broadcast %cst_38 : f32 to vector<8x1xf32>
    %112 = arith.addf %108, %111 : vector<8x1xf32>
    %113 = math.rsqrt %112 : vector<8x1xf32>
    %114 = vector.broadcast %113 : vector<8x1xf32> to vector<8x128xf32>
    %115 = arith.mulf %110, %114 : vector<8x128xf32>
    %c0_39 = arith.constant 0 : index
    %c0_40 = arith.constant 0 : index
    %c0_41 = arith.constant 0 : index
    %116 = vector.load %arg8[%c0_39, %c0_40, %c0_41] : memref<1x1x128xf32, #tpu.memory_space<vmem>>, vector<1x1x128xf32>
    %117 = vector.shape_cast %116 : vector<1x1x128xf32> to vector<1x128xf32>
    %118 = vector.broadcast %117 : vector<1x128xf32> to vector<8x128xf32>
    %119 = arith.mulf %115, %118 : vector<8x128xf32>
    %c0_42 = arith.constant 0 : index
    %c0_43 = arith.constant 0 : index
    %c0_44 = arith.constant 0 : index
    %120 = vector.load %arg9[%c0_42, %c0_43, %c0_44] : memref<1x1x128xf32, #tpu.memory_space<vmem>>, vector<1x1x128xf32>
    %121 = vector.shape_cast %120 : vector<1x1x128xf32> to vector<1x128xf32>
    %122 = vector.broadcast %121 : vector<1x128xf32> to vector<8x128xf32>
    %123 = arith.addf %119, %122 : vector<8x128xf32>
    %124 = arith.truncf %123 : vector<8x128xf32> to vector<8x128xbf16>
    %c0_45 = arith.constant 0 : index
    %c0_46 = arith.constant 0 : index
    %c0_47 = arith.constant 0 : index
    %125 = vector.load %arg10[%c0_45, %c0_46, %c0_47] : memref<1x128x256xbf16, #tpu.memory_space<vmem>>, vector<1x128x256xbf16>
    %126 = vector.shape_cast %125 : vector<1x128x256xbf16> to vector<128x256xbf16>
    %cst_48 = arith.constant dense<0.000000e+00> : vector<8x256xf32>
    %127 = tpu.matmul %124, %126, %cst_48 {dimension_numbers = #tpu.dot_dimension_numbers<[1], [0], [0], [1], [0, 0, 1, 1], [], []>} : vector<8x128xbf16>, vector<128x256xbf16>, vector<8x256xf32> -> vector<8x256xf32>
    %c0_49 = arith.constant 0 : index
    %c0_50 = arith.constant 0 : index
    %c0_51 = arith.constant 0 : index
    %128 = vector.load %arg11[%c0_49, %c0_50, %c0_51] : memref<1x1x256xf32, #tpu.memory_space<vmem>>, vector<1x1x256xf32>
    %129 = vector.shape_cast %128 : vector<1x1x256xf32> to vector<1x256xf32>
    %130 = vector.broadcast %129 : vector<1x256xf32> to vector<8x256xf32>
    %131 = arith.addf %127, %130 : vector<8x256xf32>
    %132 = arith.mulf %131, %131 : vector<8x256xf32>
    %133 = arith.mulf %131, %132 : vector<8x256xf32>
    %cst_52 = arith.constant 4.471500e-02 : f32
    %134 = vector.broadcast %cst_52 : f32 to vector<8x256xf32>
    %135 = arith.mulf %134, %133 : vector<8x256xf32>
    %136 = arith.addf %131, %135 : vector<8x256xf32>
    %cst_53 = arith.constant 0.797884583 : f32
    %137 = vector.broadcast %cst_53 : f32 to vector<8x256xf32>
    %138 = arith.mulf %137, %136 : vector<8x256xf32>
    %139 = math.tanh %138 : vector<8x256xf32>
    %cst_54 = arith.constant 1.000000e+00 : f32
    %140 = vector.broadcast %cst_54 : f32 to vector<8x256xf32>
    %141 = arith.addf %140, %139 : vector<8x256xf32>
    %cst_55 = arith.constant 5.000000e-01 : f32
    %142 = vector.broadcast %cst_55 : f32 to vector<8x256xf32>
    %143 = arith.mulf %142, %141 : vector<8x256xf32>
    %144 = arith.mulf %131, %143 : vector<8x256xf32>
    %145 = arith.truncf %144 : vector<8x256xf32> to vector<8x256xbf16>
    %c0_56 = arith.constant 0 : index
    %c0_57 = arith.constant 0 : index
    %c0_58 = arith.constant 0 : index
    %146 = vector.load %arg12[%c0_56, %c0_57, %c0_58] : memref<1x256x128xbf16, #tpu.memory_space<vmem>>, vector<1x256x128xbf16>
    %147 = vector.shape_cast %146 : vector<1x256x128xbf16> to vector<256x128xbf16>
    %cst_59 = arith.constant dense<0.000000e+00> : vector<8x128xf32>
    %148 = tpu.matmul %145, %147, %cst_59 {dimension_numbers = #tpu.dot_dimension_numbers<[1], [0], [0], [1], [0, 0, 1, 1], [], []>} : vector<8x256xbf16>, vector<256x128xbf16>, vector<8x128xf32> -> vector<8x128xf32>
    %c0_60 = arith.constant 0 : index
    %c0_61 = arith.constant 0 : index
    %c0_62 = arith.constant 0 : index
    %149 = vector.load %arg13[%c0_60, %c0_61, %c0_62] : memref<1x1x128xf32, #tpu.memory_space<vmem>>, vector<1x1x128xf32>
    %150 = vector.shape_cast %149 : vector<1x1x128xf32> to vector<1x128xf32>
    %151 = vector.broadcast %150 : vector<1x128xf32> to vector<8x128xf32>
    %152 = arith.addf %148, %151 : vector<8x128xf32>
    %153 = arith.addf %152, %123 : vector<8x128xf32>
    %cst_63 = arith.constant dense<0.000000e+00> : vector<8xf32>
    %154 = vector.multi_reduction <add>, %153, %cst_63 [1] : vector<8x128xf32> to vector<8xf32>
    %155 = vector.shape_cast %154 : vector<8xf32> to vector<8x1xf32>
    %cst_64 = arith.constant 1.280000e+02 : f32
    %156 = vector.broadcast %cst_64 : f32 to vector<8x1xf32>
    %157 = arith.divf %155, %156 : vector<8x1xf32>
    %158 = vector.broadcast %157 : vector<8x1xf32> to vector<8x128xf32>
    %159 = arith.subf %153, %158 : vector<8x128xf32>
    %160 = arith.mulf %159, %159 : vector<8x128xf32>
    %cst_65 = arith.constant dense<0.000000e+00> : vector<8xf32>
    %161 = vector.multi_reduction <add>, %160, %cst_65 [1] : vector<8x128xf32> to vector<8xf32>
    %162 = vector.shape_cast %161 : vector<8xf32> to vector<8x1xf32>
    %cst_66 = arith.constant 1.280000e+02 : f32
    %163 = vector.broadcast %cst_66 : f32 to vector<8x1xf32>
    %164 = arith.divf %162, %163 : vector<8x1xf32>
    %165 = vector.broadcast %157 : vector<8x1xf32> to vector<8x128xf32>
    %166 = arith.subf %153, %165 : vector<8x128xf32>
    %cst_67 = arith.constant 9.99999974E-6 : f32
    %167 = vector.broadcast %cst_67 : f32 to vector<8x1xf32>
    %168 = arith.addf %164, %167 : vector<8x1xf32>
    %169 = math.rsqrt %168 : vector<8x1xf32>
    %170 = vector.broadcast %169 : vector<8x1xf32> to vector<8x128xf32>
    %171 = arith.mulf %166, %170 : vector<8x128xf32>
    %c0_68 = arith.constant 0 : index
    %c0_69 = arith.constant 0 : index
    %c0_70 = arith.constant 0 : index
    %172 = vector.load %arg14[%c0_68, %c0_69, %c0_70] : memref<1x1x128xf32, #tpu.memory_space<vmem>>, vector<1x1x128xf32>
    %173 = vector.shape_cast %172 : vector<1x1x128xf32> to vector<1x128xf32>
    %174 = vector.broadcast %173 : vector<1x128xf32> to vector<8x128xf32>
    %175 = arith.mulf %171, %174 : vector<8x128xf32>
    %c0_71 = arith.constant 0 : index
    %c0_72 = arith.constant 0 : index
    %c0_73 = arith.constant 0 : index
    %176 = vector.load %arg15[%c0_71, %c0_72, %c0_73] : memref<1x1x128xf32, #tpu.memory_space<vmem>>, vector<1x1x128xf32>
    %177 = vector.shape_cast %176 : vector<1x1x128xf32> to vector<1x128xf32>
    %178 = vector.broadcast %177 : vector<1x128xf32> to vector<8x128xf32>
    %179 = arith.addf %175, %178 : vector<8x128xf32>
    %c0_74 = arith.constant 0 : index
    %c0_75 = arith.constant 0 : index
    %180 = vector.load %arg21[%c0_74, %c0_75] : memref<8x128xf32, #tpu.memory_space<vmem>>, vector<8x128xf32>
    tpu.vector_store %arg21[%c0_74, %c0_75], %179 {strides = array<i32>} : memref<8x128xf32, #tpu.memory_space<vmem>>, vector<8x128xf32>,
    %c1_i32 = arith.constant 1 : i32
    %181 = arith.cmpi eq, %arg1, %c1_i32 : i32
    %182 = arith.extui %181 : i1 to i32
    %c0_i32_76 = arith.constant 0 : i32
    %183 = arith.cmpi ne, %182, %c0_i32_76 : i32
    scf.if %183 {
      %cst_77 = arith.constant dense<0.000000e+00> : vector<128xf32>
      %184 = vector.multi_reduction <add>, %179, %cst_77 [0] : vector<8x128xf32> to vector<128xf32>
      %185 = vector.shape_cast %184 : vector<128xf32> to vector<1x128xf32>
      %cst_78 = arith.constant 8.000000e+00 : f32
      %186 = vector.broadcast %cst_78 : f32 to vector<1x128xf32>
      %187 = arith.divf %185, %186 : vector<1x128xf32>
      %188 = arith.truncf %187 : vector<1x128xf32> to vector<1x128xbf16>
      %c0_79 = arith.constant 0 : index
      %c0_80 = arith.constant 0 : index
      %189 = vector.load %arg16[%c0_79, %c0_80] : memref<128x128xf32, #tpu.memory_space<vmem>>, vector<128x128xf32>
      %190 = arith.truncf %189 : vector<128x128xf32> to vector<128x128xbf16>
      %cst_81 = arith.constant dense<0.000000e+00> : vector<1x128xf32>
      %191 = tpu.matmul %188, %190, %cst_81 {dimension_numbers = #tpu.dot_dimension_numbers<[1], [0], [0], [1], [0, 0, 1, 1], [], []>} : vector<1x128xbf16>, vector<128x128xbf16>, vector<1x128xf32> -> vector<1x128xf32>
      %c0_82 = arith.constant 0 : index
      %c0_83 = arith.constant 0 : index
      %192 = vector.load %arg17[%c0_82, %c0_83] : memref<1x128xf32, #tpu.memory_space<vmem>>, vector<1x128xf32>
      %193 = arith.addf %191, %192 : vector<1x128xf32>
      %194 = vector.shape_cast %193 : vector<1x128xf32> to vector<1x1x128xf32>
      %c0_84 = arith.constant 0 : index
      %c0_85 = arith.constant 0 : index
      %c0_86 = arith.constant 0 : index
      %195 = vector.load %arg19[%c0_84, %c0_85, %c0_86] : memref<1x1x128xf32, #tpu.memory_space<vmem>>, vector<1x1x128xf32>
      tpu.vector_store %arg19[%c0_84, %c0_85, %c0_86], %194 {strides = array<i32>} : memref<1x1x128xf32, #tpu.memory_space<vmem>>, vector<1x1x128xf32>,
      %c0_87 = arith.constant 0 : index
      %c0_88 = arith.constant 0 : index
      %c0_89 = arith.constant 0 : index
      %196 = vector.load %arg18[%c0_87, %c0_88, %c0_89] : memref<1x1x128xf32, #tpu.memory_space<vmem>>, vector<1x1x128xf32>
      %197 = vector.shape_cast %196 : vector<1x1x128xf32> to vector<1x128xf32>
      %cst_90 = arith.constant 0.000000e+00 : f32
      %198 = vector.broadcast %cst_90 : f32 to vector<1x128xf32>
      %199 = arith.maximumf %193, %198 : vector<1x128xf32>
      %200 = arith.mulf %193, %197 : vector<1x128xf32>
      %201 = arith.subf %199, %200 : vector<1x128xf32>
      %202 = math.absf %193 : vector<1x128xf32>
      %cst_91 = arith.constant 0.000000e+00 : f32
      %203 = vector.broadcast %cst_91 : f32 to vector<1x128xf32>
      %204 = arith.subf %203, %202 : vector<1x128xf32>
      %205 = math.exp %204 : vector<1x128xf32>
      %206 = math.log1p %205 : vector<1x128xf32>
      %207 = arith.addf %201, %206 : vector<1x128xf32>
      %208 = tpu.iota {dimensions = array<i32: 1>} : vector<1x128xi32>
      %c7_i32 = arith.constant 7 : i32
      %209 = vector.broadcast %c7_i32 : i32 to vector<1x128xi32>
      %210 = arith.cmpi slt, %208, %209 : vector<1x128xi32>
      %cst_92 = arith.constant 0.000000e+00 : f32
      %211 = vector.broadcast %cst_92 : f32 to vector<1x128xf32>
      %212 = arith.select %210, %207, %211 : vector<1x128xi1>, vector<1x128xf32>
      %213 = vector.shape_cast %212 : vector<1x128xf32> to vector<1x1x128xf32>
      %c0_93 = arith.constant 0 : index
      %c0_94 = arith.constant 0 : index
      %c0_95 = arith.constant 0 : index
      %214 = vector.load %arg20[%c0_93, %c0_94, %c0_95] : memref<1x1x128xf32, #tpu.memory_space<vmem>>, vector<1x1x128xf32>
      tpu.vector_store %arg20[%c0_93, %c0_94, %c0_95], %213 {strides = array<i32>} : memref<1x1x128xf32, #tpu.memory_space<vmem>>, vector<1x1x128xf32>,
    } else {
    }
    return
  }
  func.func @transform_0(%arg0: i32, %arg1: i32) -> (i32, i32, i32) {
    %c0_i32 = arith.constant 0 : i32
    %c0_i32_0 = arith.constant 0 : i32
    %c0_i32_1 = arith.constant 0 : i32
    return %arg0, %c0_i32, %c0_i32_0 : i32, i32, i32
  }
  func.func @transform_1(%arg0: i32, %arg1: i32) -> (i32, i32, i32) {
    %c0_i32 = arith.constant 0 : i32
    %c0_i32_0 = arith.constant 0 : i32
    %c0_i32_1 = arith.constant 0 : i32
    return %arg0, %c0_i32, %c0_i32_0 : i32, i32, i32
  }
  func.func @transform_2(%arg0: i32, %arg1: i32) -> (i32, i32, i32) {
    %c0_i32 = arith.constant 0 : i32
    %c0_i32_0 = arith.constant 0 : i32
    %c0_i32_1 = arith.constant 0 : i32
    return %arg1, %c0_i32, %c0_i32_0 : i32, i32, i32
  }
  func.func @transform_3(%arg0: i32, %arg1: i32) -> (i32, i32, i32) {
    %c0_i32 = arith.constant 0 : i32
    %c0_i32_0 = arith.constant 0 : i32
    %c0_i32_1 = arith.constant 0 : i32
    return %arg1, %c0_i32, %c0_i32_0 : i32, i32, i32
  }
  func.func @transform_4(%arg0: i32, %arg1: i32) -> (i32, i32, i32) {
    %c0_i32 = arith.constant 0 : i32
    %c0_i32_0 = arith.constant 0 : i32
    %c0_i32_1 = arith.constant 0 : i32
    return %arg1, %c0_i32, %c0_i32_0 : i32, i32, i32
  }
  func.func @transform_5(%arg0: i32, %arg1: i32) -> (i32, i32, i32) {
    %c0_i32 = arith.constant 0 : i32
    %c0_i32_0 = arith.constant 0 : i32
    %c0_i32_1 = arith.constant 0 : i32
    return %arg1, %c0_i32, %c0_i32_0 : i32, i32, i32
  }
  func.func @transform_6(%arg0: i32, %arg1: i32) -> (i32, i32, i32) {
    %c0_i32 = arith.constant 0 : i32
    %c0_i32_0 = arith.constant 0 : i32
    %c0_i32_1 = arith.constant 0 : i32
    return %arg1, %c0_i32, %c0_i32_0 : i32, i32, i32
  }
  func.func @transform_7(%arg0: i32, %arg1: i32) -> (i32, i32, i32) {
    %c0_i32 = arith.constant 0 : i32
    %c0_i32_0 = arith.constant 0 : i32
    %c0_i32_1 = arith.constant 0 : i32
    return %arg1, %c0_i32, %c0_i32_0 : i32, i32, i32
  }
  func.func @transform_8(%arg0: i32, %arg1: i32) -> (i32, i32, i32) {
    %c0_i32 = arith.constant 0 : i32
    %c0_i32_0 = arith.constant 0 : i32
    %c0_i32_1 = arith.constant 0 : i32
    return %arg1, %c0_i32, %c0_i32_0 : i32, i32, i32
  }
  func.func @transform_9(%arg0: i32, %arg1: i32) -> (i32, i32, i32) {
    %c0_i32 = arith.constant 0 : i32
    %c0_i32_0 = arith.constant 0 : i32
    %c0_i32_1 = arith.constant 0 : i32
    return %arg1, %c0_i32, %c0_i32_0 : i32, i32, i32
  }
  func.func @transform_10(%arg0: i32, %arg1: i32) -> (i32, i32, i32) {
    %c0_i32 = arith.constant 0 : i32
    %c0_i32_0 = arith.constant 0 : i32
    %c0_i32_1 = arith.constant 0 : i32
    return %arg1, %c0_i32, %c0_i32_0 : i32, i32, i32
  }
  func.func @transform_11(%arg0: i32, %arg1: i32) -> (i32, i32, i32) {
    %c0_i32 = arith.constant 0 : i32
    %c0_i32_0 = arith.constant 0 : i32
    %c0_i32_1 = arith.constant 0 : i32
    return %arg1, %c0_i32, %c0_i32_0 : i32, i32, i32
  }
  func.func @transform_12(%arg0: i32, %arg1: i32) -> (i32, i32, i32) {
    %c0_i32 = arith.constant 0 : i32
    %c0_i32_0 = arith.constant 0 : i32
    %c0_i32_1 = arith.constant 0 : i32
    return %arg1, %c0_i32, %c0_i32_0 : i32, i32, i32
  }
  func.func @transform_13(%arg0: i32, %arg1: i32) -> (i32, i32, i32) {
    %c0_i32 = arith.constant 0 : i32
    %c0_i32_0 = arith.constant 0 : i32
    %c0_i32_1 = arith.constant 0 : i32
    return %arg1, %c0_i32, %c0_i32_0 : i32, i32, i32
  }
  func.func @transform_14(%arg0: i32, %arg1: i32) -> (i32, i32) {
    %c0_i32 = arith.constant 0 : i32
    %c0_i32_0 = arith.constant 0 : i32
    %c0_i32_1 = arith.constant 0 : i32
    return %c0_i32, %c0_i32_0 : i32, i32
  }
  func.func @transform_15(%arg0: i32, %arg1: i32) -> (i32, i32) {
    %c0_i32 = arith.constant 0 : i32
    %c0_i32_0 = arith.constant 0 : i32
    %c0_i32_1 = arith.constant 0 : i32
    return %c0_i32, %c0_i32_0 : i32, i32
  }
  func.func @transform_16(%arg0: i32, %arg1: i32) -> (i32, i32, i32) {
    %c0_i32 = arith.constant 0 : i32
    %c0_i32_0 = arith.constant 0 : i32
    %c0_i32_1 = arith.constant 0 : i32
    return %arg0, %c0_i32, %c0_i32_0 : i32, i32, i32
  }
  func.func @transform_17(%arg0: i32, %arg1: i32) -> (i32, i32, i32) {
    %c0_i32 = arith.constant 0 : i32
    %c0_i32_0 = arith.constant 0 : i32
    %c0_i32_1 = arith.constant 0 : i32
    return %arg0, %c0_i32, %c0_i32_0 : i32, i32, i32
  }
  func.func @transform_18(%arg0: i32, %arg1: i32) -> (i32, i32, i32) {
    %c0_i32 = arith.constant 0 : i32
    %c0_i32_0 = arith.constant 0 : i32
    %c0_i32_1 = arith.constant 0 : i32
    return %arg0, %c0_i32, %c0_i32_0 : i32, i32, i32
  }
}

</mosaic_0001>

<bundles_post_ra>
// kernel: tpu_custom_call.1
= control target key start
LH: loop header
LB: loop body
LE: loop exit
PB: predicated region body
PF: predicated region fallthrough
CT: control target
= control target key end

     0   :  { %s4258_s0 = inlined_call_operand.hbm [shape: bf16[2,8,128], index: 0, kind: input, shape index: {}]   ;;  %s4259_s1 = inlined_call_operand.hbm [shape: f32[2,1,128], index: 1, kind: input, shape index: {}]   ;;  %s4260_s2 = inlined_call_operand.hbm [shape: bf16[2,128,384], index: 2, kind: input, shape index: {}]   ;;  %s4261_s3 = inlined_call_operand.hbm [shape: f32[2,1,384], index: 3, kind: input, shape index: {}]   ;;  %s4262_s4 = inlined_call_operand.hbm [shape: bf16[2,128,128], index: 4, kind: input, shape index: {}]   ;;  %s4263_s5 = inlined_call_operand.vmem [shape: f32[2,1,128], index: 5, kind: input, shape index: {}]   ;;  %s4264_s6 = inlined_call_operand.hbm [shape: f32[2,1,128], index: 6, kind: input, shape index: {}]   ;;  %s4265_s7 = inlined_call_operand.hbm [shape: f32[2,1,128], index: 7, kind: input, shape index: {}]   ;;  %s4266_s8 = inlined_call_operand.hbm [shape: bf16[2,128,256], index: 8, kind: input, shape index: {}]   ;;  %s4267_s9 = inlined_call_operand.vmem [shape: f32[2,1,256], index: 9, kind: input, shape index: {}]   ;;  %s4268_s10 = inlined_call_operand.hbm [shape: bf16[2,256,128], index: 10, kind: input, shape index: {}]   ;;  %s4269_s11 = inlined_call_operand.vmem [shape: f32[2,1,128], index: 11, kind: input, shape index: {}]   ;;  %s4270_s12 = inlined_call_operand.vmem [shape: f32[2,1,128], index: 12, kind: input, shape index: {}]   ;;  %s4271_s13 = inlined_call_operand.vmem [shape: f32[2,1,128], index: 13, kind: input, shape index: {}]   ;;  %s4272_s14 = inlined_call_operand.hbm [shape: f32[128,128], index: 14, kind: input, shape index: {}]   ;;  %s4273_s15 = inlined_call_operand.hbm [shape: f32[1,128], index: 15, kind: input, shape index: {}]   ;;  %s4274_s16 = inlined_call_operand.vmem [shape: f32[2,1,128], index: 16, kind: input, shape index: {}]   ;;  %s4275_s17 = inlined_call_operand.hbm [shape: f32[2,1,128], index: 17, kind: output, shape index: {0}]   ;;  %s4276_s18 = inlined_call_operand.hbm [shape: f32[2,1,128], index: 18, kind: output, shape index: {1}]  }
   0x1   :  { %4314 = sst [smem:[#allocation53_spill]] %s4258_s0 }
   0x2   :  { %4315 = sst [smem:[#allocation54_spill]] %s4259_s1 }
   0x3   :  { %4316 = sst [smem:[#allocation55_spill]] %s4260_s2 }
   0x4   :  { %4317 = sst [smem:[#allocation56_spill]] %s4261_s3 }
   0x5   :  { %4318 = sst [smem:[#allocation57_spill]] %s4262_s4 }
   0x6   :  { %4319 = sst [smem:[#allocation58_spill]] %s4263_s5 }
   0x7   :  { %4320 = sst [smem:[#allocation59_spill]] %s4264_s6 }
   0x8   :  { %4321 = sst [smem:[#allocation60_spill]] %s4265_s7 }
   0x9   :  { %4322 = sst [smem:[#allocation61_spill]] %s4266_s8 }
   0xa   :  { %4323 = sst [smem:[#allocation62_spill]] %s4267_s9 }
   0xb   :  { %4324 = sst [smem:[#allocation63_spill]] %s4268_s10 }
   0xc   :  { %4325 = sst [smem:[#allocation64_spill]] %s4269_s11 }
   0xd   :  { %4326 = sst [smem:[#allocation65_spill]] %s4270_s12 }
   0xe   :  { %4327 = sst [smem:[#allocation66_spill]] %s4271_s13 }
   0xf   :  { %4328 = sst [smem:[#allocation67_spill]] %s4272_s14 }
  0x10   :  { %4329 = sst [smem:[#allocation68_spill]] %s4273_s15 }
  0x11   :  { %4330 = sst [smem:[#allocation69_spill]] %s4274_s16 }
  0x12   :  { %4331 = sst [smem:[#allocation70_spill]] %s4275_s17 }
  0x13   :  { %4332 = sst [smem:[#allocation71_spill]] %s4276_s18 }
  0x14   :  { %24 = vsyncpa [#allocation4], 0 }
  0x15   :  { %26 = vsyncpa [#allocation4 + $0x1], 0 }
  0x16   :  { %27 = vsyncpa [#allocation7], 0 }
  0x17   :  { %29 = vsyncpa [#allocation7 + $0x1], 0 }
  0x18   :  { %30 = vsyncpa [#allocation10], 0 }
  0x19   :  { %32 = vsyncpa [#allocation10 + $0x1], 0 }
  0x1a   :  { %33 = vsyncpa [#allocation13], 0 }
  0x1b   :  { %35 = vsyncpa [#allocation13 + $0x1], 0 }
  0x1c   :  { %36 = vsyncpa [#allocation16], 0 }
  0x1d   :  { %38 = vsyncpa [#allocation16 + $0x1], 0 }
  0x1e   :  { %39 = vsyncpa [#allocation19], 0 }
  0x1f   :  { %40 = vsyncpa [#allocation5], 0 }
  0x20   :  { %42 = vsyncpa [#allocation5 + $0x1], 0 }
  0x21   :  { %43 = vsyncpa [#allocation23], 0 }
  0x22   :  { %45 = vsyncpa [#allocation23 + $0x1], 0  ;;  %s3615_s27 = smov 0   ;;  %s3617_s28 = smov 0  }
  0x23   :  { %s3619_s29 = smov 0   ;;  %s3621_s30 = smov 0  }
  0x24   :  { %s3623_s0 = smov 0   ;;  %s3625_s19 = smov 0  }
  0x25   :  { %s3627_s1 = smov 0   ;;  %s3629_s20 = smov 0  }
  0x26   :  { %s3631_s21 = smov 0   ;;  %s3633_s22 = smov 0  }
  0x27   :  { %s3635_s2 = smov 0  }
  0x28 LB: > { %4333 = sst [smem:[#allocation33_spill]] %s3469_s28  ;;  %s3671_s23 = sadd.s32 4294967295, %s3505_s2   ;;  %s3505_s2 = sphi %s3635_s2, %s51_s2   ;;  %s3501_s22 = sphi %s3633_s22, %s4424_s22   ;;  %s3497_s21 = sphi %s3631_s21, %s4423_s21   ;;  %s3493_s20 = sphi %s3629_s20, %s4422_s20   ;;  %s3489_s1 = sphi %s3627_s1, %s4421_s1   ;;  %s3485_s19 = sphi %s3625_s19, %s4420_s19   ;;  %s3481_s0 = sphi %s3623_s0, %s4419_s0   ;;  %s3477_s30 = sphi %s3621_s30, %s4418_s30   ;;  %s3473_s29 = sphi %s3619_s29, %s4417_s29   ;;  %s3469_s28 = sphi %s3617_s28, %s4416_s28   ;;  %s3465_s27 = sphi %s3615_s27, %s4415_s27  }
  0x29   : > { %4334 = sst [smem:[#allocation34_spill]] %s3473_s29  ;;  %p2414_p0 = scmp.ge.s32.totalorder %s3505_s2, 1 }
  0x2a   : > { %4335 = sst [smem:[#allocation35_spill]] %s3477_s30  ;;  %p84_p1 = scmp.eq.s32.totalorder %s3671_s23, 0 }
  0x2b   : > { %4336 = sst [smem:[#allocation36_spill]] %s3481_s0  ;;  %p552_p2 = scmp.lt.s32.totalorder %s3505_s2, 5 }
  0x2c   : > { %4337 = sst [smem:[#allocation37_spill]] %s3485_s19  ;;  %s3507_s17 = smov [#allocation18]  }
  0x2d   : > { %4338 = sst [smem:[#allocation38_spill]] %s3489_s1  ;;  %p3679_p3 = pnand %p2414_p0, %p552_p2 }
  0x2e   : > { %4339 = sst [smem:[#allocation39_spill]] %s3493_s20  ;;  %s565_s16 = sshll.u32 %s3507_s17, 4  ;;  %s566_s16 = int_to_ptr.vmem [resolvable:$true] %s565_s16 }
  0x2f   : > { %4340 = sst [smem:[#allocation40_spill]] %s3497_s21  ;;  %p2809_p4 = pneg %p3679_p3 }
  0x30   : > { %4341 = sst [smem:[#allocation41_spill]] %s3501_s22  ;;  %s4279_s25 = smov 128  }
  0x31   : > { %4342 = sst [smem:[#allocation42_spill]] %s3505_s2  ;;  %p3687_p5 = pnand %p2809_p4, %p84_p1 }
  0x32   : > { %4343 = sst [smem:[#allocation43_spill]] %s3671_s23  ;;  %s2413_s17 = sadd.s32 4294967294, %s3505_s2  }
  0x33   : > { %s4344_s14 = sld [smem:[#allocation67_spill]]  ;;  %s60_s13 = sadd.s32 1, %s3497_s21 }
  0x34   : > { %s4345_s18 = scalar_select %p3679_p3, 1, 0 }
  0x35   : > { %s4346_s24 = scalar_select %p3687_p5, 1, 0 }
  0x36   : > { %s63_s12 = sadd.s32 1, %s3501_s22  ;;  %p61_p6 = scmp.ge.s32.totalorder %s60_s13, 2 }
  0x37   : > { %s70_s11 = sadd.s32 1, %s3485_s19  ;;  %p4285_p7 = scmp.ne.s32.totalorder %s3485_s19, %s3481_s0 }
  0x38   : > { %p78_p8 = scmp.eq.s32.totalorder %s3505_s2, 0  ;;  %s4426_s13 = smov (%p61_p6, %s60_s13), 0 }
  0x39   : > { %s563_s26 = sshll.u32 %s4344_s14, 4  ;;  %s4280_s14 = smov 8   ;;  %s564_s26 = int_to_ptr.hbm [resolvable:$true] %s563_s26 }
  0x3a   : > { %2812 = dma.hbm_to_vmem [thread:$0]  (!%p3687_p5), %s564_s26, 2048, %s566_s16, [#allocation19], %s4279_s25, %s4279_s25, %s4280_s14  }
  0x3b   : > { %4347 = sst [smem:[#allocation44_spill]] %s4426_s13  ;;  %s4428_s12 = smov (!%p61_p6, %s63_s12), %s3501_s22 }
  0x3c   : > { %p3711_p9 = por %p78_p8, %p4285_p7  ;;  %p4284_p10 = scmp.ne.s32.totalorder %s3481_s0, %s3477_s30 }
  0x3d   : > { %p65_p11 = scmp.ge.s32.totalorder %s4428_s12, 2  ;;  %s119_s26 = ssub.s32 %s3497_s21, %s4426_s13 }
  0x3e   : > { %p3724_p12 = por %p84_p1, %p4284_p10  ;;  %p120_p13 = scmp.eq.s32.totalorder %s119_s26, 0 }
  0x3f   : > { %s4430_s12 = smov (%p65_p11, %s4428_s12), 0  ;;  %s122_s14 = sadd.s32 1, %s3473_s29 }
  0x40   : > { %s4349_s25 = scalar_select %p3724_p12, 1, 0 }
  0x41   : > { %4350 = sst [smem:[#allocation45_spill]] %s4430_s12  ;;  %p129_p0 = scmp.ne.s32.totalorder %s3473_s29, %s3469_s28 }
  0x42   : > { %s67_s13 = ssub.s32 %s3501_s22, %s4430_s12  ;;  %p135_p2 = scmp.ne.s32.totalorder %s3469_s28, %s3465_s27 }
  0x43   : > { %p68_p4 = scmp.eq.s32.totalorder %s67_s13, 0  ;;  %p3739_p6 = por %p129_p0, %p78_p8 }
  0x44   : > { %s3744_s5 = scalar_select %p120_p13, %s3473_s29, %s122_s14  }
  0x45   : > { %s3747_s26 = scalar_select %p68_p4, %s3485_s19, %s70_s11  }
  0x46   : > { %4352 = sst [smem:[#allocation46_spill]] %s3744_s5  ;;  %p3751_p11 = por %p135_p2, %p84_p1 }
  0x47   : > { %4353 = sst [smem:[#allocation47_spill]] %s3747_s26  ;;  %p513_p10 = scmp.eq.s32.totalorder %s3671_s23, 3 }
  0x48   : > { %s4354_s20 = scalar_select %p3751_p11, 1, 0 }
  0x49   : > { %p519_p7 = scmp.eq.s32.totalorder %s2413_s17, 3  ;;  %p2853_p12 = scmp.lt.s32.totalorder %s3505_s2, 4 }
  0x4a   : > { %4355 = sst [smem:[#allocation48_spill]] %s4354_s20  ;;  %p4356_p3 = scmp.ne.s32.totalorder %s3485_s19, %s3481_s0 }
  0x4b   : > { %s3765_s14 = sand.u32 1, %s3485_s19   ;;  %p4359_p8 = scmp.ne.s32.totalorder %s3481_s0, %s3477_s30 }
  0x4c   : > { %p3760_p5 = por %p513_p10, %p4356_p3  ;;  %p3776_p0 = pnand %p2853_p12, %p3711_p9 }
  0x4d   : > { %p3770_p13 = por %p519_p7, %p4359_p8  ;;  %s3781_s17 = sand.u32 1, %s3505_s2  }
  0x4e   : > { %s4357_s13 = scalar_select %p3760_p5, 1, 0 }
  0x4f   : > { %s4360_s11 = scalar_select %p3770_p13, 1, 0 }
  0x50   : > { %4358 = sst [smem:[#allocation49_spill]] %s4357_s13  ;;  %s613_s30 = scalar_lea.vmem [#allocation6], %s3765_s14 }
  0x51   : > { %4361 = sst [smem:[#allocation50_spill]] %s4360_s11  ;;  %s620_s13 = sshll.u32 %s613_s30, 4  ;;  %s621_s13 = int_to_ptr.vmem [resolvable:$true] %s620_s13 }
  0x52   : > { %s4363_s5 = sld [smem:[#allocation54_spill]]  ;;  %p3790_p3 = pnand %p2853_p12, %p3739_p6 }
  0x53   : > { %s4301_s11 = scalar_lea.sflag [#allocation7], %s3781_s17  ;;  %s3800_s12 = sand.u32 1, %s3473_s29  }
  0x54   : > { %s2776_s30 = smul.u32 3, %s3497_s21  ;;  %s4365_s3 = sld [smem:[#allocation56_spill]] }
  0x55   : > { %s4366_s6 = sld [smem:[#allocation59_spill]]  ;;  %s4303_s29 = scalar_lea.sflag [#allocation10], %s3781_s17 }
  0x56   : > { %s4367_s8 = sld [smem:[#allocation61_spill]]  ;;  %p4372_p7 = scmp.ne.s32.totalorder %s4346_s24, 0 }
  0x57   : > { %s4370_s10 = sld [smem:[#allocation63_spill]]  ;;  %s2774_s24 = smul.u32 192, %s3497_s21 }
  0x58   : > { %s616_s19 = scalar_lea.hbm %s4363_s5, %s3501_s22  ;;  %s2775_s5 = smul.u32 3, %s3800_s12 }
  0x59   : > { %s618_s1 = sshll.u32 %s616_s19, 4  ;;  %s4371_s15 = sld [smem:[#allocation68_spill]]  ;;  %s619_s1 = int_to_ptr.hbm [resolvable:$true] %s618_s1 }
  0x5a   : > { %2822 = dma.hbm_to_vmem [thread:$0]  (!%p3776_p0), %s619_s1, 16, %s621_s13, %s4301_s11  }
  0x5b   : > { %s657_s9 = scalar_lea.hbm %s4365_s3, %s2776_s30  ;;  %s653_s2 = scalar_lea.vmem [#allocation9], %s2775_s5 }
  0x5c   : > { %s661_s20 = sshll.u32 %s653_s2, 4  ;;  %s659_s28 = sshll.u32 %s657_s9, 4  ;;  %s662_s20 = int_to_ptr.vmem [resolvable:$true] %s661_s20  ;;  %s660_s28 = int_to_ptr.hbm [resolvable:$true] %s659_s28 }
  0x5d   : > { %s702_s11 = scalar_lea.hbm %s4366_s6, %s3497_s21  ;;  %s699_s30 = scalar_lea.vmem [#allocation12], %s3800_s12 }
  0x5e   : > { %2828 = dma.hbm_to_vmem [thread:$0]  (!%p3790_p3), %s660_s28, 48, %s662_s20, %s4303_s29  }
  0x5f   : > { %s704_s19 = sshll.u32 %s702_s11, 4  ;;  %s706_s26 = sshll.u32 %s699_s30, 4  ;;  %s705_s19 = int_to_ptr.hbm [resolvable:$true] %s704_s19  ;;  %s707_s26 = int_to_ptr.vmem [resolvable:$true] %s706_s26 }
  0x60   : > { %s4304_s2 = scalar_lea.sflag [#allocation13], %s3781_s17  ;;  %s2424_s5 = sshll.u32 %s3800_s12, 7 }
  0x61   : > { %2834 = dma.hbm_to_vmem [thread:$0]  (!%p3790_p3), %s705_s19, 16, %s707_s26, %s4304_s2  }
  0x62   : > { %s2707_s9 = sshll.u32 %s3497_s21, 7  ;;  %s734_s6 = scalar_lea.vmem [#allocation15], %s2424_s5 }
  0x63   : > { %s739_s3 = scalar_lea.hbm %s4367_s8, %s2707_s9  ;;  %s742_s28 = sshll.u32 %s734_s6, 4  ;;  %s743_s28 = int_to_ptr.vmem [resolvable:$true] %s742_s28 }
  0x64   : > { %s740_s20 = sshll.u32 %s739_s3, 4  ;;  %s4307_s11 = scalar_lea.sflag [#allocation16], %s3781_s17  ;;  %s741_s20 = int_to_ptr.hbm [resolvable:$true] %s740_s20 }
  0x65   : > { %s4368_s30 = smov 8   ;;  %s4369_s29 = smov 128  }
  0x66   : > { %2840 = dma.hbm_to_vmem [thread:$0]  (!%p3790_p3), %s741_s20, 2048, %s743_s28, %s4307_s11, %s4369_s29, %s4369_s29, %s4368_s30  }
  0x67   : > { %s768_s1 = scalar_lea.hbm %s4370_s10, %s2707_s9  ;;  %s763_s13 = scalar_lea.vmem [#allocation17], %s2424_s5 }
  0x68   : > { %s771_s2 = sshll.u32 %s763_s13, 4  ;;  %s769_s6 = sshll.u32 %s768_s1, 4  ;;  %s3838_s2 = int_to_ptr.vmem [resolvable:$true] %s771_s2  ;;  %s3840_s6 = int_to_ptr.hbm [resolvable:$true] %s769_s6 }
  0x69   : > { %s578_s23 = sshll.u32 %s4371_s15, 4  ;;  %s3510_s29 = smov [#allocation20]   ;;  %s579_s23 = int_to_ptr.hbm [resolvable:$true] %s578_s23 }
  0x6a   : > { %s580_s28 = sshll.u32 %s3510_s29, 4  ;;  %s2418_s9 = sshll.u32 %s3765_s14, 2  ;;  %s581_s28 = int_to_ptr.vmem [resolvable:$true] %s580_s28 }
  0x6b   : > { %2815 = dma.hbm_to_vmem [thread:$0]  (!%p4372_p7), %s579_s23, 16, %s581_s28, [#allocation19]  }
  0x6c   : > { %s2419_s5 = sshll.u32 %s3501_s22, 2  ;;  %s4373_s19 = sld [smem:[#allocation53_spill]] }
  0x6d   : > { %s595_s1 = scalar_lea.vmem [#allocation3], %s2418_s9  ;;  %s2773_s3 = smul.u32 192, %s3800_s12 }
  0x6e   : > { %s603_s13 = sshll.u32 %s595_s1, 4  ;;  %s592_s29 = scalar_lea.sflag [#allocation4], %s3765_s14  ;;  %s604_s13 = int_to_ptr.vmem [resolvable:$true] %s603_s13 }
  0x6f   : > { %s631_s23 = scalar_lea.vmem [#allocation8], %s2773_s3  ;;  %s4374_s20 = sld [smem:[#allocation55_spill]] }
  0x70   : > { %s639_s28 = sshll.u32 %s631_s23, 4  ;;  %s2421_s30 = sshll.u32 %s3800_s12, 6  ;;  %s640_s28 = int_to_ptr.vmem [resolvable:$true] %s639_s28 }
  0x71   : > { %s4375_s14 = scalar_lea.sflag [#allocation7], %s3781_s17  ;;  %s2706_s27 = sshll.u32 %s3497_s21, 6 }
  0x72   : > { %s599_s26 = scalar_lea.hbm %s4373_s19, %s2419_s5  ;;  %s3511_s19 = smov 192  }
  0x73   : > { %s601_s8 = sshll.u32 %s599_s26, 4  ;;  %s3512_s26 = smov 12   ;;  %s602_s8 = int_to_ptr.hbm [resolvable:$true] %s601_s8 }
  0x74   : > { %2819 = dma.hbm_to_vmem [thread:$0]  (!%p3776_p0), %s602_s8, 64, %s604_s13, %s592_s29  }
  0x75   : > { %s636_s5 = scalar_lea.hbm %s4374_s20, %s2774_s24  ;;  %s4376_s4 = sld [smem:[#allocation57_spill]] }
  0x76   : > { %s637_s9 = sshll.u32 %s636_s5, 4  ;;  %s672_s11 = scalar_lea.vmem [#allocation11], %s2421_s30  ;;  %s638_s9 = int_to_ptr.hbm [resolvable:$true] %s637_s9 }
  0x77   : > { %2825 = dma.hbm_to_vmem [thread:$0]  (!%p3790_p3), %s638_s9, 3072, %s640_s28, %s4375_s14, %s3511_s19, %s3511_s19, %s3512_s26  }
  0x78   : > { %s680_s8 = sshll.u32 %s672_s11, 4  ;;  %s3513_s29 = smov 64   ;;  %s681_s8 = int_to_ptr.vmem [resolvable:$true] %s680_s8 }
  0x79   : > { %s3514_s24 = smov 4   ;;  %s4377_s23 = scalar_lea.sflag [#allocation10], %s3781_s17 }
  0x7a   : > { %s4378_s7 = sld [smem:[#allocation60_spill]]  ;;  %s716_s9 = scalar_lea.vmem [#allocation14], %s3800_s12 }
  0x7b   : > { %s677_s10 = scalar_lea.hbm %s4376_s4, %s2706_s27  ;;  %s723_s19 = sshll.u32 %s716_s9, 4  ;;  %s724_s19 = int_to_ptr.vmem [resolvable:$true] %s723_s19 }
  0x7c   : > { %s678_s3 = sshll.u32 %s677_s10, 4  ;;  %s4379_s30 = scalar_lea.sflag [#allocation13], %s3781_s17  ;;  %s679_s3 = int_to_ptr.hbm [resolvable:$true] %s678_s3 }
  0x7d   : > { %2831 = dma.hbm_to_vmem [thread:$0]  (!%p3790_p3), %s679_s3, 1024, %s681_s8, %s4377_s23, %s3513_s29, %s3513_s29, %s3514_s24  }
  0x7e   : > { %s4380_s14 = scalar_lea.sflag [#allocation16], %s3781_s17  ;;  %p4381_p9 = scmp.ne.s32.totalorder %s4345_s18, 0 }
  0x7f   : > { %2843 = dma.hbm_to_vmem [thread:$0]  (!%p3790_p3), %s3840_s6, 2048, %s3838_s2, %s4380_s14, %s3513_s29, %s3513_s29, %s3514_s24  }
  0x80   : > { %s719_s5 = scalar_lea.hbm %s4378_s7, %s3497_s21  ;;  %807 = sbr.rel (%p4381_p9) target bundleno = 2627 (0xa43), region = 88 }
  0x81   : > { %s721_s26 = sshll.u32 %s719_s5, 4  ;;  %s722_s26 = int_to_ptr.hbm [resolvable:$true] %s721_s26 }
  0x82   : > { %2837 = dma.hbm_to_vmem [thread:$0]  (!%p3790_p3), %s722_s26, 16, %s724_s19, %s4379_s30  }
  0x85   : > { %s3891_s27 = sand.u32 1, %s3481_s0   ;;  %p4382_p10 = scmp.ne.s32.totalorder %s4349_s25, 0 }
  0x86   : > { %s2431_s12 = sshll.u32 %s3891_s27, 2  ;;  %s810_s1 = scalar_lea.sflag [#allocation4], %s3891_s27 }
  0x87   : > { %s3895_s13 = scalar_lea.vmem [#allocation3], %s2431_s12 }
  0x88   : > { %3428 = dma.done.wait (%p4382_p10), %s810_s1, 64  }
  0x89   : > { %3430 = vsyncadd (%p4382_p10), %s810_s1, 4294967232  ;;  %s4383_s17 = sld [smem:[#allocation43_spill]] }
  0x8f   : > { %s819_s18 = sand.u32 1, %s4383_s17  }
  0x90   : > { %s820_s16 = scalar_lea.sflag [#allocation7], %s819_s18 }
  0x91   : > { %3432 = dma.done.wait (%p4382_p10), %s820_s16, 16  }
  0x92   : > { %3434 = vsyncadd (%p4382_p10), %s820_s16, 4294967280  ;;  %s4384_s6 = sld [smem:[#allocation33_spill]] }
  0x98   : > { %s3908_s11 = sand.u32 1, %s4384_s6  }
  0x99   : > { %4386 = sst [smem:[#allocation51_spill]] %s3908_s11  ;;  %s2777_s8 = smul.u32 192, %s3908_s11 }
  0x9b   : > { %s3911_s3 = scalar_lea.vmem [#allocation8], %s2777_s8 }
  0x9c   : > { %3436 = dma.done.wait (%p3751_p11), %s820_s16, 3072  }
  0x9d   : > { %3438 = vsyncadd (%p3751_p11), %s820_s16, 4294964224  ;;  %s2778_s29 = smul.u32 3, %s3908_s11  ;;  %s839_s24 = scalar_lea.sflag [#allocation10], %s819_s18 }
  0x9f   : > { %s3918_s23 = scalar_lea.vmem [#allocation9], %s2778_s29 }
  0xa0   : > { %3440 = dma.done.wait (%p3751_p11), %s839_s24, 1072  }
  0xa1   : > { %3442 = vsyncadd (%p3751_p11), %s839_s24, 4294966224  ;;  %s2432_s25 = sshll.u32 %s3908_s11, 6  ;;  %s859_s20 = scalar_lea.sflag [#allocation13], %s819_s18 }
  0xa2   : > { %s3925_s28 = scalar_lea.vmem [#allocation11], %s2432_s25 }
  0xa3   : > { %3444 = dma.done.wait (%p3751_p11), %s859_s20, 32  }
  0xa4   : > { %3446 = vsyncadd (%p3751_p11), %s859_s20, 4294967264  ;;  %s2433_s9 = sshll.u32 %s3908_s11, 7  ;;  %s877_s26 = scalar_lea.sflag [#allocation16], %s819_s18 }
  0xa5   : > { %s3934_s30 = scalar_lea.vmem [#allocation15], %s2433_s9 }
  0xa6   : > { %3448 = dma.done.wait (%p3751_p11), %s877_s26, 4096  }
  0xa7   : > { %3450 = vsyncadd (%p3751_p11), %s877_s26, 4294963200  ;;  %s3940_s14 = scalar_lea.vmem [#allocation17], %s2433_s9 }
  0xa8   : > { %4387 = sst [smem:[#allocation52_spill]] %s3940_s14 }
  0xa9   : > { %3452 = dma.done.wait (%p84_p1), [#allocation19], 2064  }
  0xaa   : > { %3454 = vsyncadd (%p84_p1), [#allocation19], 4294965232  ;;  %s4388_s12 = sld [smem:[#allocation38_spill]]  ;;  %s1006_s14 = scalar_lea.vmem [#allocation21], %s3891_s27 }
  0xab   : > { %s4389_s1 = sld [smem:[#allocation39_spill]]  ;;  %s1012_s29 = scalar_lea.vmem [#allocation22], %s3891_s27 }
  0xac   : > { %s4391_s25 = sld [smem:[#allocation62_spill]] }
  0xad   : > { %s4392_s19 = sld [smem:[#allocation64_spill]] }
  0xae   : > { %s4393_s7 = sld [smem:[#allocation65_spill]] }
  0xaf   : > { %s4394_s0 = sld [smem:[#allocation66_spill]] }
  0xb0   : > { %p1013_p12 = scmp.lt.s32.totalorder %s4388_s12, 1  ;;  %s4395_s10 = sld [smem:[#allocation69_spill]] }
  0xb1   : > { %p1029_p2 = scmp.lt.s32.totalorder %s4389_s1, 1  ;;  %p2438_p1 = scmp.ne.s32.totalorder %s4388_s12, 0 }
  0xb2   : > { %s3949_s18 = scalar_select %p1013_p12, %s4388_s12, 1 }
  0xb3   : > { %s4432_s1 = smov (!%p1029_p2, %s4389_s1), 1  ;;  %1036 = sbr.rel (%p2438_p1) target bundleno = 188 (0xbc), region = 136 }
  0xb4   : > { %s2437_s8 = sshll.u32 %s3949_s18, 1  ;;  %s1022_s5 = scalar_lea.vmem %s4392_s19, %s3949_s18 }
  0xb5   : > { %s3962_s20 = scalar_lea.vmem %s4391_s25, %s2437_s8  ;;  %s1025_s15 = scalar_lea.vmem %s4393_s7, %s3949_s18 }
  0xb6   : > { %s1028_s16 = scalar_lea.vmem %s4394_s0, %s3949_s18  ;;  %s1031_s11 = scalar_lea.vmem %s4395_s10, %s4432_s1 }
  0xb8   : > { %v1037_v0 = vld [vmem:[%s3895_s13] sm:$0xf] }
  0xb9   : > { %v1038_v1 = vunpack.c.l.bf16 %v1037_v0 }
  0xbb   : > { %1039 = vst [vmem:[#allocation2] sm:$0xff] %v1038_v1 }
  0xbc PF: > { %v2525_v2 = vld [vmem:[%s3911_s3 + $0xa8] sm:$0xf]  ;;  %v2731_v3 = vld [vmem:[%s3911_s3 + $0xb0] sm:$0xf0]  ;;  %v2730_v4 = vld [vmem:[%s3911_s3 + $0xac] sm:$0xf] }
  0xbd   : > { %v2526_v5 = vor.u32 %v2731_v3, %v2525_v2  ;;  %v2527_v6 = vld [vmem:[%s3911_s3 + $0xb4] sm:$0xf0]  ;;  %v2513_v7 = vld [vmem:[%s3911_s3 + $0x90] sm:$0xf]  ;;  %v2728_v8 = vld [vmem:[%s3911_s3 + $0x98] sm:$0xf0] }
  0xbe   : > { %v2530_v9 = vor.u32 %v2730_v4, %v2527_v6  ;;  %v2727_v10 = vld [vmem:[%s3911_s3 + $0x94] sm:$0xf]  ;;  %v2515_v11 = vld [vmem:[%s3911_s3 + $0x9c] sm:$0xf0]  ;;  %v2514_v12 = vor.u32 %v2728_v8, %v2513_v7  ;;  %v2501_v14 = vld [vmem:[%s3911_s3 + $0x78] sm:$0xf] }
  0xbf   : > { %1211 = vmatpush.bf16.msra.mxu0 %v2526_v5  ;;  %v2518_v13 = vor.u32 %v2727_v10, %v2515_v11  ;;  %v2725_v15 = vld [vmem:[%s3911_s3 + $0x80] sm:$0xf0]  ;;  %v2724_v16 = vld [vmem:[%s3911_s3 + $0x7c] sm:$0xf]  ;;  %v2503_v17 = vld [vmem:[%s3911_s3 + $0x84] sm:$0xf0] }
  0xc0   : > { %1224 = vmatpush.bf16.msra.mxu1 %v2530_v9  ;;  %v2502_v18 = vor.u32 %v2725_v15, %v2501_v14  ;;  %v2506_v19 = vor.u32 %v2724_v16, %v2503_v17  ;;  %v2489_v20 = vld [vmem:[%s3911_s3 + $0x60] sm:$0xf]  ;;  %v2722_v21 = vld [vmem:[%s3911_s3 + $0x68] sm:$0xf0]  ;;  %v2721_v22 = vld [vmem:[%s3911_s3 + $0x64] sm:$0xf] }
  0xc1   : > { %v2491_v23 = vld [vmem:[%s3911_s3 + $0x6c] sm:$0xf0]  ;;  %v2490_v24 = vor.u32 %v2722_v21, %v2489_v20  ;;  %v2732_v26 = vld [vmem:[%s3911_s3 + $0xb8] sm:$0xf0]  ;;  %v2521_v27 = vld [vmem:[%s3911_s3 + $0x98] sm:$0xf] }
  0xc2   : > { %v2533_v25 = vld [vmem:[%s3911_s3 + $0xb0] sm:$0xf]  ;;  %v2494_v28 = vor.u32 %v2721_v22, %v2491_v23  ;;  %v2477_v29 = vld [vmem:[%s3911_s3 + $0x48] sm:$0xf]  ;;  %v2719_v30 = vld [vmem:[%s3911_s3 + $0x50] sm:$0xf0] }
  0xc3   : > { %1212 = vmatpush.bf16.msra.mxu0 %v2514_v12  ;;  %v2534_v31 = vor.u32 %v2732_v26, %v2533_v25  ;;  %v2729_v32 = vld [vmem:[%s3911_s3 + $0xa0] sm:$0xf0]  ;;  %v2718_v33 = vld [vmem:[%s3911_s3 + $0x4c] sm:$0xf]  ;;  %v2479_v34 = vld [vmem:[%s3911_s3 + $0x54] sm:$0xf0]  ;;  %v2478_v36 = vor.u32 %v2719_v30, %v2477_v29 }
  0xc4   : > { %1225 = vmatpush.bf16.msra.mxu1 %v2518_v13  ;;  %v2522_v35 = vor.u32 %v2729_v32, %v2521_v27  ;;  %v2465_v37 = vld [vmem:[%s3911_s3 + $0x30] sm:$0xf]  ;;  %v2509_v38 = vld [vmem:[%s3911_s3 + $0x80] sm:$0xf]  ;;  %v2726_v39 = vld [vmem:[%s3911_s3 + $0x88] sm:$0xf0]  ;;  %v2482_v40 = vor.u32 %v2718_v33, %v2479_v34 }
  0xc5   : > { %1237 = vmatpush.bf16.msra.mxu2 %v2534_v31  ;;  %v2716_v41 = vld [vmem:[%s3911_s3 + $0x38] sm:$0xf0]  ;;  %v2715_v42 = vld [vmem:[%s3911_s3 + $0x34] sm:$0xf]  ;;  %v2467_v43 = vld [vmem:[%s3911_s3 + $0x3c] sm:$0xf0]  ;;  %v2510_v44 = vor.u32 %v2726_v39, %v2509_v38 }
  0xc6   : > { %v2466_v45 = vor.u32 %v2716_v41, %v2465_v37  ;;  %v2497_v46 = vld [vmem:[%s3911_s3 + $0x68] sm:$0xf]  ;;  %v2723_v47 = vld [vmem:[%s3911_s3 + $0x70] sm:$0xf0]  ;;  %v2470_v48 = vor.u32 %v2715_v42, %v2467_v43  ;;  %v2453_v49 = vld [vmem:[%s3911_s3 + $0x18] sm:$0xf] }
  0xc7   : > { %1213 = vmatpush.bf16.msra.mxu0 %v2502_v18  ;;  %v2713_v50 = vld [vmem:[%s3911_s3 + $0x20] sm:$0xf0]  ;;  %v2712_v51 = vld [vmem:[%s3911_s3 + $0x1c] sm:$0xf]  ;;  %v2455_v52 = vld [vmem:[%s3911_s3 + $0x24] sm:$0xf0]  ;;  %v2498_v53 = vor.u32 %v2723_v47, %v2497_v46 }
  0xc8   : > { %1226 = vmatpush.bf16.msra.mxu1 %v2506_v19  ;;  %v2454_v54 = vor.u32 %v2713_v50, %v2453_v49  ;;  %v2485_v55 = vld [vmem:[%s3911_s3 + $0x50] sm:$0xf]  ;;  %v2720_v56 = vld [vmem:[%s3911_s3 + $0x58] sm:$0xf0]  ;;  %v2458_v57 = vor.u32 %v2712_v51, %v2455_v52  ;;  %v2441_v58 = vld [vmem:[%s3911_s3] sm:$0xf] }
  0xc9   : > { %1238 = vmatpush.bf16.msra.mxu2 %v2522_v35  ;;  %v2710_v59 = vld [vmem:[%s3911_s3 + $0x8] sm:$0xf0]  ;;  %v2709_v60 = vld [vmem:[%s3911_s3 + $0x4] sm:$0xf]  ;;  %v2443_v61 = vld [vmem:[%s3911_s3 + $0xc] sm:$0xf0]  ;;  %v2486_v62 = vor.u32 %v2720_v56, %v2485_v55 }
  0xca   : > { %v2442_v63 = vor.u32 %v2710_v59, %v2441_v58  ;;  %v4026_v0 = vld [vmem:[#allocation2] sm:$0xff]  ;;  %v2473_v1 = vld [vmem:[%s3911_s3 + $0x38] sm:$0xf]  ;;  %v2717_v2 = vld [vmem:[%s3911_s3 + $0x40] sm:$0xf0]  ;;  %v2446_v3 = vor.u32 %v2709_v60, %v2443_v61  ;;  %vm1258_vm0 = vcmask 261120  }
  0xcb   : > { %1214 = vmatpush.bf16.msra.mxu0 %v2490_v24  ;;  %v1042_v4 = vpack.c.bf16 %v4026_v0, %v4026_v0  ;;  %v2474_v5 = vor.u32 %v2717_v2, %v2473_v1  ;;  %v2461_v6 = vld [vmem:[%s3911_s3 + $0x20] sm:$0xf]  ;;  %v2714_v7 = vld [vmem:[%s3911_s3 + $0x28] sm:$0xf0]  ;;  %v2449_v9 = vld [vmem:[%s3911_s3 + $0x8] sm:$0xf] }
  0xcc   : > { %1227 = vmatpush.bf16.msra.mxu1 %v2494_v28  ;;  %v2462_v8 = vor.u32 %v2714_v7, %v2461_v6  ;;  %v2711_v10 = vld [vmem:[%s3911_s3 + $0x10] sm:$0xf0]  ;;  %v1075_v12 = vld [vmem:[%s3918_s23] sm:$0x7]  ;;  %s3515_s4 = smov 64   ;;  %s3516_s7 = smov 96  }
  0xcd   : > { %1239 = vmatpush.bf16.msra.mxu2 %v2510_v44  ;;  %v2450_v11 = vor.u32 %v2711_v10, %v2449_v9  ;;  %v1077_v13 = vperm.slane %v1075_v12, 0  ;;  %v1078_v14 = vperm.slane %v1075_v12, 1  ;;  %s3517_s0 = smov 32   ;;  %v1079_v28 = vperm.slane %v1075_v12, 2  ;;  %s4396_s21 = scalar_lea.vmem [#allocation6], %s3891_s27 }
  0xce   : > { %vm1294_vm1 = vcmask 1043456   ;;  %v2958_v37 = vld [vmem:[%s4396_s21] ss:$0 sm:$0xff]  ;;  %vm1278_vm2 = vcmask 64512   ;;  %vm1497_vm3 = vcmask 523264   ;;  %vm1499_vm4 = vcmask 785408  }
  0xcf   : > { %1215 = vmatpush.bf16.msra.mxu0 %v2478_v36  ;;  %s4397_s2 = sld [smem:[#allocation58_spill]] }
  0xd0   : > { %1228 = vmatpush.bf16.msra.mxu1 %v2482_v40  ;;  %s4399_s23 = sld [smem:[#allocation52_spill]] }
  0xd1   : > { %1240 = vmatpush.bf16.msra.mxu2 %v2498_v53  ;;  %s4406_s17 = sld [smem:[#allocation38_spill]] }
  0xd3   : > { %1216 = vmatpush.bf16.msra.mxu0 %v2466_v45 }
  0xd4   : > { %1229 = vmatpush.bf16.msra.mxu1 %v2470_v48 }
  0xd5   : > { %1241 = vmatpush.bf16.msra.mxu2 %v2486_v62  ;;  %s4398_s3 = scalar_lea.vmem %s4397_s2, %s3949_s18 }
  0xd7   : > { %1217 = vmatpush.bf16.msra.mxu0 %v2454_v54  ;;  %p2703_p4 = scmp.ne.s32.totalorder %s4406_s17, 1 }
  0xd8   : > { %1230 = vmatpush.bf16.msra.mxu1 %v2458_v57 }
  0xd9   : > { %1242 = vmatpush.bf16.msra.mxu2 %v2474_v5 }
  0xdb   : > { %1218 = vmatpush.bf16.msra.mxu0 %v2442_v63 }
  0xdc   : > { %1231 = vmatpush.bf16.msra.mxu1 %v2446_v3 }
  0xdd   : > { %1243 = vmatpush.bf16.msra.mxu2 %v2462_v8 }
  0xde   : > { %1219 = vmatmul.bf16.vlgmr.msra.gmra.mxu0 %v1042_v4 }
  0xdf   : > { %1232 = vmatmul.bf16.vlgmr.msra.gmra.mxu1 %v1042_v4 }
  0xe1   : > { %1244 = vmatpush.bf16.msra.mxu2 %v2450_v11 }
  0xe4   : > { %1245 = vmatmul.bf16.vlgmr.msra.gmra.mxu2 %v1042_v4 }
 0x15b   : > { %v1220_v15 = vpop.f32.mrf.mxu0 }
 0x15c   : > { %v1221_v16 = vadd.f32 %v1220_v15, %v1077_v13  ;;  %v1233_v17 = vpop.f32.mrf.mxu1 }
 0x15d   : > { %v1234_v18 = vadd.f32 %v1233_v17, %v1078_v14 }
 0x15f   : > { %v1250_v19 = vpack.c.bf16 %v1234_v18, %v1221_v16 }
 0x161   : > { %v1256_v20 = vunpack.c.h.b16 %v1250_v19  ;;  %v1311_v25 = vunpack.c.l.b16 %v1250_v19 }
 0x163   : > { %v1222_v21 = vpop.f32.mrf.mxu0  ;;  %v1257_v22 = vpack.c.b16 %v1256_v20, %v1256_v20  ;;  %v1312_v26 = vpack.c.b16 %v1311_v25, %v1311_v25 }
 0x164   : > { %v1235_v23 = vpop.f32.mrf.mxu1 }
 0x165   : > { %1374 = vrot.lane.b32.xlu2 %v1257_v22, %s3515_s4  ;;  %1315 = vrot.lane.b32.xlu1 %v1257_v22, %s3516_s7  ;;  %v1263_v24 = vsel %vm1258_vm0, %v1257_v22, 0 }
 0x166   : > { %1272 = vmatpush.bf16.xpose.msra.mxu3 %v1263_v24 }
 0x167   : > { %v1246_v27 = vpop.f32.mrf.mxu2 }
 0x168   : > { %v1247_v29 = vadd.f32 %v1246_v27, %v1079_v28 }
 0x16a   : > { %v1251_v31 = vpack.c.bf16 %v1247_v29, %v1247_v29 }
 0x16c   : > { %v1296_v32 = vsel %vm1294_vm1, %v1251_v31, 0  ;;  %v1349_v7 = vunpack.c.l.b16 %v1251_v31 }
 0x16d   : > { %1430 = vrot.lane.b32.xlu2 %v1257_v22, %s3517_s0  ;;  %1313 = vrot.lane.b32.xlu1 %v1312_v26, %s3516_s7 }
 0x16e   : > { %2535 = vmatmul.msk.bf16.vlgmr.msra.gmra.mxu3 %vm1258_vm0, %v1250_v19  ;;  %v1350_v8 = vpack.c.b16 %v1349_v7, %v1349_v7  ;;  %v2756_v7 = vld [vmem:[%s3934_s30 + $0x74] sm:$0xf0] }
 0x16f   : > { %v1248_v30 = vpop.f32.mrf.mxu2  ;;  %1305 = vmatpush.bf16.msrb.mxu3 %v1296_v32 }
 0x175   : > { %1428 = vrot.lane.b32.xlu1 %v1312_v26, %s3517_s0 }
 0x1bf   : > { %v1375_v33 = vpop.permute.xlu2 %1374 }
 0x1c0   : > { %v1380_v34 = vsel %vm1258_vm0, %v1375_v33, 0 }
 0x1c1   : > { %1389 = vmatpush.bf16.xpose.msrb.mxu2 %v1380_v34 }
 0x1c7   : > { %v1431_v50 = vpop.permute.xlu2 %1430 }
 0x1c8   : > { %v1436_v52 = vsel %vm1258_vm0, %v1431_v50, 0  ;;  %v2738_v50 = vld [vmem:[%s3925_s28 + $0x28] sm:$0xff] }
 0x1d7   : > { %v1316_v35 = vpop.permute.xlu1 %1315 }
 0x1d8   : > { %v1321_v36 = vsel %vm1258_vm0, %v1316_v35, 0 }
 0x1d9   : > { %1330 = vmatpush.bf16.xpose.msra.mxu3 %v1321_v36 }
 0x1df   : > { %v1314_v54 = vpop.permute.xlu1 %1313 }
 0x1e7   : > { %v1429_v55 = vpop.permute.xlu1 %1428 }
 0x1f1   : > { %v1274_v38 = vpop.f32.mrf.mxu3 }
 0x1f2   : > { %v1275_v39 = vadd.f32 %v2958_v37, %v1274_v38 }
 0x1f4   : > { %v1279_v40 = vsel %vm1278_vm2, %v1275_v39, -inf }
 0x1f5   : > { %1280 = vmax.xlane.f32.xlu0 %v1279_v40 }
 0x1f9   : > { %v1276_v41 = vpop.f32.mrf.mxu3 }
 0x268   : > { %v1281_v42 = vpop.xlane.xlu0 %1280 }
 0x269   : > { %v1282_v43 = vsub.f32 %v1275_v39, %v1281_v42 }
 0x26b   : > { %v1283_v44 = vmul.f32 1.442695, %v1282_v43 }
 0x26d   : > { %2965 = vpow2.f32 %v1283_v44 }
 0x273   : > { %v2966_v45 = vpop.eup %2965 }
 0x274   : > { %v1285_v46 = vsel %vm1278_vm2, %v2966_v45, 0.0 }
 0x275   : > { %1286 = vadd.xlane.f32.xlu0 %v1285_v46 }
 0x289   : > { %1372 = vrot.lane.b32.xlu0 %v1312_v26, %s3515_s4 }
 0x2e8   : > { %v1287_v47 = vpop.xlane.xlu0 %1286 }
 0x2e9   : > { %2967 = vrcp.f32 %v1287_v47 }
 0x2ef   : > { %v2968_v48 = vpop.eup %2967 }
 0x2f0   : > { %v1289_v49 = vmul.f32 %v2968_v48, %v2966_v45  ;;  %v2740_v48 = vld [vmem:[%s3925_s28 + $0x38] sm:$0xff] }
 0x2f1   : > { %1570 = vmatpush.bf16.msrb.mxu1 %v2740_v48 }
 0x2f2   : > { %v1290_v51 = vpack.c.bf16 %v1289_v49, %v1289_v49  ;;  %v2739_v49 = vld [vmem:[%s3925_s28 + $0x30] sm:$0xff] }
 0x2f4   : > { %2536 = vmatmul.msk.bf16.vlgmr.msrb.gmra.mxu3 %vm1278_vm2, %v1290_v51  ;;  %v2737_v51 = vld [vmem:[%s3925_s28 + $0x20] sm:$0xff] }
 0x2f5   : > { %1445 = vmatpush.bf16.xpose.msrb.mxu3 %v1436_v52  ;;  %1571 = vmatpush.bf16.msrb.mxu1 %v2739_v49  ;;  %v2736_v52 = vld [vmem:[%s3925_s28 + $0x18] sm:$0xff]  ;;  %v2595_v49 = vld [vmem:[%s3934_s30 + $0x28] sm:$0xf0] }
 0x2f9   : > { %1572 = vmatpush.bf16.msrb.mxu1 %v2738_v50 }
 0x2fb   : > { %v1373_v53 = vpop.permute.xlu0 %1372 }
 0x2fc   : > { %2539 = vmatmul.msk.bf16.vlgmr.msrb.gmra.mxu2 %vm1258_vm0, %v1373_v53  ;;  %v2735_v53 = vld [vmem:[%s3925_s28 + $0x10] sm:$0xff] }
 0x2fd   : > { %1573 = vmatpush.bf16.msrb.mxu1 %v2737_v51  ;;  %v2585_v51 = vld [vmem:[%s3934_s30 + $0x10] sm:$0xf] }
 0x301   : > { %1574 = vmatpush.bf16.msrb.mxu1 %v2736_v52  ;;  %v2744_v52 = vld [vmem:[%s3934_s30 + $0x14] sm:$0xf0] }
 0x304   : > { %2537 = vmatmul.msk.bf16.vlgmr.msra.gmra.mxu3 %vm1258_vm0, %v1314_v54  ;;  %v2734_v54 = vld [vmem:[%s3925_s28 + $0x8] sm:$0xff] }
 0x305   : > { %1575 = vmatpush.bf16.msrb.mxu1 %v2735_v53  ;;  %v2743_v53 = vld [vmem:[%s3934_s30 + $0x14] sm:$0xf] }
 0x309   : > { %1576 = vmatpush.bf16.msrb.mxu1 %v2734_v54  ;;  %v2586_v54 = vor.u32 %v2744_v52, %v2585_v51 }
 0x314   : > { %2541 = vmatmul.msk.bf16.vlgmr.msrb.gmra.mxu3 %vm1258_vm0, %v1429_v55  ;;  %v2733_v55 = vld [vmem:[%s3925_s28] sm:$0xff]  ;;  %s4400_s28 = sld [smem:[#allocation51_spill]] }
 0x315   : > { %1577 = vmatpush.bf16.msrb.mxu1 %v2733_v55  ;;  %v2587_v55 = vld [vmem:[%s3934_s30 + $0x18] sm:$0xf0] }
 0x31a   : > { %s4401_s19 = scalar_lea.vmem [#allocation12], %s4400_s28 }
 0x377   : > { %v4057_v56 = vpop.f32.mrf.mxu3 }
 0x37f   : > { %v1309_v57 = vpop.f32.mrf.mxu3  ;;  %v1391_v58 = vpop.f32.mrf.mxu2 }
 0x380   : > { %v1392_v59 = vadd.f32 %v2958_v37, %v1391_v58 }
 0x382   : > { %v1395_v60 = vsel %vm1278_vm2, %v1392_v59, -inf }
 0x383   : > { %1396 = vmax.xlane.f32.xlu1 %v1395_v60 }
 0x387   : > { %v1332_v61 = vpop.f32.mrf.mxu3  ;;  %v1393_v62 = vpop.f32.mrf.mxu2 }
 0x388   : > { %v1333_v63 = vadd.f32 %v2958_v37, %v1332_v61 }
 0x38a   : > { %v1336_v1 = vsel %vm1278_vm2, %v1333_v63, -inf }
 0x38b   : > { %1337 = vmax.xlane.f32.xlu2 %v1336_v1  ;;  %v2959_v1 = vld [vmem:[%s4398_s3] ss:$0 sm:$0xff] }
 0x38f   : > { %v1334_v2 = vpop.f32.mrf.mxu3 }
 0x397   : > { %v1447_v3 = vpop.f32.mrf.mxu3 }
 0x398   : > { %v1448_v4 = vadd.f32 %v2958_v37, %v1447_v3 }
 0x39a   : > { %v1451_v5 = vsel %vm1278_vm2, %v1448_v4, -inf }
 0x39b   : > { %1452 = vmax.xlane.f32.xlu0 %v1451_v5 }
 0x39f   : > { %v1449_v6 = vpop.f32.mrf.mxu3 }
 0x3a0   : > { %v3518_v6 = vmov 128.0  }
 0x3af   : > { %1407 = vrot.lane.b32.xlu0 %v1350_v8, %s3515_s4 }
 0x3f6   : > { %v1397_v9 = vpop.xlane.xlu1 %1396 }
 0x3f7   : > { %v1398_v10 = vsub.f32 %v1392_v59, %v1397_v9 }
 0x3f9   : > { %v1399_v11 = vmul.f32 1.442695, %v1398_v10  ;;  %v2635_v10 = vld [vmem:[%s3934_s30 + $0x78] sm:$0xf0] }
 0x3fb   : > { %2969 = vpow2.f32 %v1399_v11 }
 0x3fe   : > { %v1338_v12 = vpop.xlane.xlu2 %1337 }
 0x3ff   : > { %v1339_v13 = vsub.f32 %v1333_v63, %v1338_v12 }
 0x401   : > { %v2970_v14 = vpop.eup %2969  ;;  %v1340_v15 = vmul.f32 1.442695, %v1339_v13 }
 0x402   : > { %v1401_v16 = vsel %vm1278_vm2, %v2970_v14, 0.0 }
 0x403   : > { %2971 = vpow2.f32 %v1340_v15  ;;  %1402 = vadd.xlane.f32.xlu1 %v1401_v16 }
 0x409   : > { %v2972_v17 = vpop.eup %2971 }
 0x40a   : > { %v1342_v18 = vsel %vm1278_vm2, %v2972_v17, 0.0 }
 0x40b   : > { %1343 = vadd.xlane.f32.xlu2 %v1342_v18 }
 0x40e   : > { %v1453_v19 = vpop.xlane.xlu0 %1452 }
 0x40f   : > { %v1454_v20 = vsub.f32 %v1448_v4, %v1453_v19 }
 0x411   : > { %v1455_v21 = vmul.f32 1.442695, %v1454_v20 }
 0x413   : > { %2973 = vpow2.f32 %v1455_v21  ;;  %v2625_v21 = vld [vmem:[%s3934_s30 + $0x60] sm:$0xf] }
 0x419   : > { %v2974_v22 = vpop.eup %2973 }
 0x41a   : > { %v1457_v23 = vsel %vm1278_vm2, %v2974_v22, 0.0 }
 0x41b   : > { %1458 = vadd.xlane.f32.xlu1 %v1457_v23  ;;  %v2753_v23 = vld [vmem:[%s3934_s30 + $0x64] sm:$0xf] }
 0x421   : > { %v1408_v24 = vpop.permute.xlu0 %1407 }
 0x422   : > { %v1413_v25 = vsel %vm1294_vm1, %v1408_v24, 0 }
 0x423   : > { %1351 = vrot.lane.b32.xlu2 %v1350_v8, %s3516_s7  ;;  %1422 = vmatpush.bf16.msra.mxu2 %v1413_v25  ;;  %v2627_v25 = vld [vmem:[%s3934_s30 + $0x68] sm:$0xf0] }
 0x434   : > { %1463 = vrot.lane.b32.xlu1 %v1350_v8, %s3517_s0  ;;  %v2755_v8 = vld [vmem:[%s3934_s30 + $0x74] sm:$0xf] }
 0x435   : > { %v2638_v11 = vor.u32 %v2755_v8, %v2635_v10 }
 0x437   : > { %1737 = vmatpush.bf16.msra.mxu3 %v2638_v11  ;;  %v2960_v11 = vld [vmem:[%s4401_s19] ss:$0 sm:$0xff] }
 0x476   : > { %v1403_v26 = vpop.xlane.xlu1 %1402 }
 0x477   : > { %2975 = vrcp.f32 %v1403_v26  ;;  %v2630_v26 = vor.u32 %v2753_v23, %v2627_v25  ;;  %v2769_v23 = vld [vmem:[%s4399_s23 + $0x60] sm:$0xff]  ;;  %v2768_v25 = vld [vmem:[%s4399_s23 + $0x58] sm:$0xff] }
 0x479   : > { %1738 = vmatpush.bf16.msra.mxu3 %v2630_v26  ;;  %v2759_v26 = vld [vmem:[%s4399_s23 + $0x10] sm:$0xff] }
 0x47d   : > { %v2976_v27 = vpop.eup %2975 }
 0x47e   : > { %v1405_v28 = vmul.f32 %v2976_v27, %v2970_v14  ;;  %v1344_v29 = vpop.xlane.xlu2 %1343  ;;  %v2617_v27 = vld [vmem:[%s3934_s30 + $0x50] sm:$0xf] }
 0x47f   : > { %2977 = vrcp.f32 %v1344_v29  ;;  %v2751_v29 = vld [vmem:[%s3934_s30 + $0x54] sm:$0xf] }
 0x480   : > { %v1406_v30 = vpack.c.bf16 %v1405_v28, %v1405_v28  ;;  %v2752_v28 = vld [vmem:[%s3934_s30 + $0x54] sm:$0xf0] }
 0x482   : > { %2540 = vmatmul.msk.bf16.vlgmr.msra.gmra.mxu2 %vm1278_vm2, %v1406_v30  ;;  %v2618_v30 = vor.u32 %v2752_v28, %v2617_v27  ;;  %v2767_v27 = vld [vmem:[%s4399_s23 + $0x50] sm:$0xff]  ;;  %v2758_v28 = vld [vmem:[%s4399_s23 + $0x8] sm:$0xff] }
 0x485   : > { %v2978_v31 = vpop.eup %2977 }
 0x486   : > { %v1346_v32 = vmul.f32 %v2978_v31, %v2972_v17  ;;  %v1352_v33 = vpop.permute.xlu2 %1351  ;;  %v2619_v31 = vld [vmem:[%s3934_s30 + $0x58] sm:$0xf0] }
 0x487   : > { %v1357_v34 = vsel %vm1294_vm1, %v1352_v33, 0  ;;  %v2609_v33 = vld [vmem:[%s3934_s30 + $0x40] sm:$0xf] }
 0x488   : > { %1366 = vmatpush.bf16.msrb.mxu0 %v1357_v34  ;;  %v1347_v35 = vpack.c.bf16 %v1346_v32, %v1346_v32  ;;  %v2622_v32 = vor.u32 %v2751_v29, %v2619_v31  ;;  %v2750_v34 = vld [vmem:[%s3934_s30 + $0x44] sm:$0xf0]  ;;  %v2766_v29 = vld [vmem:[%s4399_s23 + $0x48] sm:$0xff] }
 0x489   : > { %v2765_v31 = vld [vmem:[%s4399_s23 + $0x40] sm:$0xff] }
 0x48a   : > { %1739 = vmatpush.bf16.msra.mxu3 %v2622_v32  ;;  %v1638_v32 = vld [vmem:[%s3962_s20] sm:$0x3] }
 0x48b   : > { %2538 = vmatmul.msk.bf16.vlgmr.msrb.gmra.mxu0 %vm1278_vm2, %v1347_v35  ;;  %v2749_v35 = vld [vmem:[%s3934_s30 + $0x44] sm:$0xf] }
 0x48e   : > { %v1459_v36 = vpop.xlane.xlu1 %1458 }
 0x48f   : > { %2979 = vrcp.f32 %v1459_v36  ;;  %v2610_v36 = vor.u32 %v2750_v34, %v2609_v33  ;;  %v1640_v33 = vperm.slane %v1638_v32, 0  ;;  %v1641_v34 = vperm.slane %v1638_v32, 1 }
 0x490   : > { %2981 = vrcp.f32 %v3518_v6 }
 0x495   : > { %v2980_v37 = vpop.eup %2979 }
 0x496   : > { %v1461_v38 = vmul.f32 %v2980_v37, %v2974_v22  ;;  %v2982_v12 = vpop.eup %2981  ;;  %v2754_v22 = vld [vmem:[%s3934_s30 + $0x64] sm:$0xf0]  ;;  %v2611_v37 = vld [vmem:[%s3934_s30 + $0x48] sm:$0xf0] }
 0x497   : > { %v1587_v13 = vmul.f32 128.0, %v2982_v12  ;;  %vm1591_vm5 = vweird.f32 %v2982_v12  ;;  %v2626_v24 = vor.u32 %v2754_v22, %v2625_v21  ;;  %v2770_v21 = vld [vmem:[%s4399_s23 + $0x68] sm:$0xff]  ;;  %v2761_v22 = vld [vmem:[%s4399_s23 + $0x20] sm:$0xff] }
 0x498   : > { %v1462_v41 = vpack.c.bf16 %v1461_v38, %v1461_v38  ;;  %v2614_v38 = vor.u32 %v2749_v35, %v2611_v37 }
 0x499   : > { %v1588_v14 = vsub.f32 1.0, %v1587_v13 }
 0x49a   : > { %1740 = vmatpush.bf16.msra.mxu3 %v2614_v38 }
 0x4a6   : > { %v1464_v39 = vpop.permute.xlu1 %1463 }
 0x4a7   : > { %v1469_v40 = vsel %vm1294_vm1, %v1464_v39, 0  ;;  %v2601_v39 = vld [vmem:[%s3934_s30 + $0x30] sm:$0xf] }
 0x4a8   : > { %1478 = vmatpush.bf16.msra.mxu0 %v1469_v40  ;;  %v2748_v40 = vld [vmem:[%s3934_s30 + $0x34] sm:$0xf0] }
 0x4ab   : > { %2542 = vmatmul.msk.bf16.vlgmr.msra.gmra.mxu0 %vm1278_vm2, %v1462_v41  ;;  %v2747_v41 = vld [vmem:[%s3934_s30 + $0x34] sm:$0xf] }
 0x505   : > { %v1424_v42 = vpop.f32.mrf.mxu2 }
 0x508   : > { %v1368_v43 = vpop.f32.mrf.mxu0 }
 0x509   : > { %1485 = vrot.lane.b32.xlu2 %v1368_v43, %s3517_s0  ;;  %v2603_v43 = vld [vmem:[%s3934_s30 + $0x38] sm:$0xf0] }
 0x50d   : > { %v1426_v44 = vpop.f32.mrf.mxu2 }
 0x50e   : > { %v2606_v44 = vor.u32 %v2747_v41, %v2603_v43 }
 0x510   : > { %v1370_v45 = vpop.f32.mrf.mxu0  ;;  %1741 = vmatpush.bf16.msra.mxu3 %v2606_v44 }
 0x511   : > { %1489 = vrot.lane.b32.xlu2 %v1424_v42, %s3515_s4  ;;  %v2602_v42 = vor.u32 %v2748_v40, %v2601_v39  ;;  %v2593_v45 = vld [vmem:[%s3934_s30 + $0x20] sm:$0xf] }
 0x528   : > { %v1480_v46 = vpop.f32.mrf.mxu0 }
 0x529   : > { %1493 = vrot.lane.b32.xlu0 %v1480_v46, %s3516_s7  ;;  %v2746_v46 = vld [vmem:[%s3934_s30 + $0x24] sm:$0xf0] }
 0x52a   : > { %v2594_v48 = vor.u32 %v2746_v46, %v2593_v45 }
 0x530   : > { %v1482_v47 = vpop.f32.mrf.mxu0 }
 0x531   : > { %v2745_v47 = vld [vmem:[%s3934_s30 + $0x24] sm:$0xf] }
 0x532   : > { %v2598_v50 = vor.u32 %v2745_v47, %v2595_v49 }
 0x534   : > { %1742 = vmatpush.bf16.msra.mxu3 %v2598_v50 }
 0x563   : > { %v1486_v57 = vpop.permute.xlu2 %1485 }
 0x564   : > { %v1496_v59 = vsel %vm1258_vm0, %v4057_v56, %v1486_v57  ;;  %v2633_v56 = vld [vmem:[%s3934_s30 + $0x70] sm:$0xf]  ;;  %v2577_v57 = vld [vmem:[%s3934_s30] sm:$0xf] }
 0x565   : > { %v2634_v9 = vor.u32 %v2756_v7, %v2633_v56 }
 0x567   : > { %1724 = vmatpush.bf16.msrb.mxu2 %v2634_v9 }
 0x56b   : > { %v1490_v58 = vpop.permute.xlu2 %1489  ;;  %1725 = vmatpush.bf16.msrb.mxu2 %v2626_v24  ;;  %v2760_v24 = vld [vmem:[%s4399_s23 + $0x18] sm:$0xff] }
 0x56c   : > { %v1498_v60 = vsel %vm1497_vm3, %v1496_v59, %v1490_v58  ;;  %v2742_v58 = vld [vmem:[%s3934_s30 + $0x4] sm:$0xf0]  ;;  %v2590_v59 = vor.u32 %v2743_v53, %v2587_v55 }
 0x56e   : > { %1743 = vmatpush.bf16.msra.mxu3 %v2590_v59 }
 0x56f   : > { %1726 = vmatpush.bf16.msrb.mxu2 %v2618_v30  ;;  %v2757_v30 = vld [vmem:[%s4399_s23] sm:$0xff] }
 0x573   : > { %1727 = vmatpush.bf16.msrb.mxu2 %v2610_v36 }
 0x577   : > { %1728 = vmatpush.bf16.msrb.mxu2 %v2602_v42 }
 0x57b   : > { %1729 = vmatpush.bf16.msrb.mxu2 %v2594_v48 }
 0x57f   : > { %1730 = vmatpush.bf16.msrb.mxu2 %v2586_v54 }
 0x59b   : > { %v1494_v61 = vpop.permute.xlu0 %1493 }
 0x59c   : > { %v1500_v62 = vsel %vm1499_vm4, %v1498_v60, %v1494_v61  ;;  %v2741_v60 = vld [vmem:[%s3934_s30 + $0x4] sm:$0xf]  ;;  %v2579_v61 = vld [vmem:[%s3934_s30 + $0x8] sm:$0xf0]  ;;  %s4402_s30 = scalar_lea.vmem [#allocation14], %s4400_s28 }
 0x59d   : > { %v1501_v63 = vpack.c.bf16 %v1500_v62, %v1500_v62  ;;  %v2578_v62 = vor.u32 %v2742_v58, %v2577_v57 }
 0x59f   : > { %1578 = vmatmul.bf16.vlgmr.msrb.gmra.mxu1 %v1501_v63  ;;  %v2582_v63 = vor.u32 %v2741_v60, %v2579_v61  ;;  %1731 = vmatpush.bf16.msrb.mxu2 %v2578_v62  ;;  %v2962_v62 = vld [vmem:[%s1022_s5] ss:$0 sm:$0xff] }
 0x5a1   : > { %1744 = vmatpush.bf16.msra.mxu3 %v2582_v63 }
 0x61c   : > { %v1579_v2 = vpop.f32.mrf.mxu1 }
 0x61d   : > { %v1580_v3 = vadd.f32 %v2959_v1, %v1579_v2  ;;  %v2764_v1 = vld [vmem:[%s4399_s23 + $0x38] sm:$0xff] }
 0x61e   : > { %v2772_v2 = vld [vmem:[%s4399_s23 + $0x78] sm:$0xff]  ;;  %1902 = vmatpush.bf16.msrb.mxu0 %v2764_v1 }
 0x61f   : > { %v1583_v4 = vadd.f32 %v1580_v3, %v4026_v0  ;;  %v1589_v0 = vmul.f32 %v2982_v12, %v1588_v14  ;;  %1915 = vmatpush.bf16.msra.mxu1 %v2772_v2  ;;  %v2961_v14 = vld [vmem:[%s4402_s30] ss:$0 sm:$0xff] }
 0x621   : > { %1584 = vadd.xlane.f32.xlu2 %v1583_v4  ;;  %v1590_v15 = vadd.f32 %v2982_v12, %v1589_v0 }
 0x623   : > { %v4097_v16 = vsel %vm1591_vm5, %v2982_v12, %v1590_v15 }
 0x624   : > { %v1581_v5 = vpop.f32.mrf.mxu1 }
 0x694   : > { %v1585_v17 = vpop.xlane.xlu2 %1584 }
 0x695   : > { %v1593_v18 = vmul.f32 %v4097_v16, %v1585_v17 }
 0x697   : > { %v4100_v19 = vsub.f32 %v1583_v4, %v1593_v18  ;;  %v2763_v18 = vld [vmem:[%s4399_s23 + $0x30] sm:$0xff] }
 0x698   : > { %1903 = vmatpush.bf16.msrb.mxu0 %v2763_v18 }
 0x699   : > { %v1595_v20 = vmul.f32 %v4100_v19, %v4100_v19 }
 0x69b   : > { %1596 = vadd.xlane.f32.xlu0 %v1595_v20  ;;  %v2771_v20 = vld [vmem:[%s4399_s23 + $0x70] sm:$0xff] }
 0x69c   : > { %1916 = vmatpush.bf16.msra.mxu1 %v2771_v20  ;;  %v2963_v20 = vld [vmem:[%s1025_s15] ss:$0 sm:$0xff] }
 0x6a0   : > { %1917 = vmatpush.bf16.msra.mxu1 %v2770_v21 }
 0x6a4   : > { %1918 = vmatpush.bf16.msra.mxu1 %v2769_v23 }
 0x6a8   : > { %1919 = vmatpush.bf16.msra.mxu1 %v2768_v25 }
 0x6ac   : > { %1920 = vmatpush.bf16.msra.mxu1 %v2767_v27 }
 0x6b0   : > { %1921 = vmatpush.bf16.msra.mxu1 %v2766_v29 }
 0x6b4   : > { %1922 = vmatpush.bf16.msra.mxu1 %v2765_v31 }
 0x70e   : > { %v1597_v3 = vpop.xlane.xlu0 %1596 }
 0x70f   : > { %v1598_v4 = vmul.f32 %v1597_v3, %v4097_v16 }
 0x711   : > { %v1599_v5 = vadd.f32 1e-05, %v1598_v4 }
 0x713   : > { %2983 = vrsqrt.f32 %v1599_v5  ;;  %vm1606_vm7 = vweird.f32 %v1599_v5 }
 0x719   : > { %v2984_v6 = vpop.eup %2983 }
 0x71a   : > { %v1601_v56 = vmul.f32 %v2984_v6, %v1599_v5  ;;  %vm1607_vm6 = vweird.f32 %v2984_v6 }
 0x71b   : > { %vm1608_vm8 = vmor %vm1606_vm7, %vm1607_vm6 }
 0x71c   : > { %v1602_v7 = vmul.f32 %v2984_v6, %v1601_v56 }
 0x71e   : > { %v1603_v8 = vmul.f32 0.5, %v1602_v7 }
 0x720   : > { %v1604_v9 = vsub.f32 1.5, %v1603_v8 }
 0x722   : > { %v1605_v10 = vmul.f32 %v2984_v6, %v1604_v9 }
 0x724   : > { %v1609_v12 = vsel %vm1608_vm8, %v2984_v6, %v1605_v10 }
 0x725   : > { %v1610_v13 = vmul.f32 %v1609_v12, %v4100_v19  ;;  %v2762_v19 = vld [vmem:[%s4399_s23 + $0x28] sm:$0xff] }
 0x726   : > { %1904 = vmatpush.bf16.msrb.mxu0 %v2762_v19 }
 0x727   : > { %v1615_v0 = vmul.f32 %v2960_v11, %v1610_v13 }
 0x729   : > { %v4140_v15 = vadd.f32 %v2961_v14, %v1615_v0 }
 0x72a   : > { %1905 = vmatpush.bf16.msrb.mxu0 %v2761_v22 }
 0x72b   : > { %v1621_v17 = vpack.c.bf16 %v4140_v15, %v4140_v15 }
 0x72d   : > { %1732 = vmatmul.bf16.vlgmr.msrb.gmra.mxu2 %v1621_v17  ;;  %1745 = vmatmul.bf16.vlgmr.msra.gmra.mxu3 %v1621_v17 }
 0x72e   : > { %1906 = vmatpush.bf16.msrb.mxu0 %v2760_v24 }
 0x732   : > { %1907 = vmatpush.bf16.msrb.mxu0 %v2759_v26 }
 0x736   : > { %1908 = vmatpush.bf16.msrb.mxu0 %v2758_v28 }
 0x73a   : > { %1909 = vmatpush.bf16.msrb.mxu0 %v2757_v30 }
 0x7b0   : > { %v1733_v35 = vpop.f32.mrf.mxu2  ;;  %v1746_v36 = vpop.f32.mrf.mxu3 }
 0x7b1   : > { %v1734_v37 = vadd.f32 %v1733_v35, %v1640_v33  ;;  %v1747_v38 = vadd.f32 %v1746_v36, %v1641_v34 }
 0x7b3   : > { %v1750_v39 = vmul.f32 %v1734_v37, %v1734_v37  ;;  %v1751_v40 = vmul.f32 %v1747_v38, %v1747_v38 }
 0x7b5   : > { %v1752_v41 = vmul.f32 %v1750_v39, %v1734_v37  ;;  %v1753_v42 = vmul.f32 %v1751_v40, %v1747_v38 }
 0x7b7   : > { %v1754_v43 = vmul.f32 0.044715, %v1752_v41  ;;  %v1755_v44 = vmul.f32 0.044715, %v1753_v42 }
 0x7b8   : > { %v1735_v45 = vpop.f32.mrf.mxu2  ;;  %v1748_v46 = vpop.f32.mrf.mxu3 }
 0x7b9   : > { %v1756_v47 = vadd.f32 %v1754_v43, %v1734_v37  ;;  %v1757_v48 = vadd.f32 %v1755_v44, %v1747_v38 }
 0x7bb   : > { %v1758_v49 = vmul.f32 0.7978846, %v1756_v47  ;;  %v1759_v50 = vmul.f32 0.7978846, %v1757_v48 }
 0x7bd   : > { %2985 = vtanh.f32 %v1758_v49 }
 0x7be   : > { %2987 = vtanh.f32 %v1759_v50 }
 0x7c3   : > { %v2986_v51 = vpop.eup %2985 }
 0x7c4   : > { %v2988_v52 = vpop.eup %2987  ;;  %v1762_v53 = vadd.f32 1.0, %v2986_v51 }
 0x7c5   : > { %v1763_v54 = vadd.f32 1.0, %v2988_v52 }
 0x7c6   : > { %v1764_v55 = vmul.f32 0.5, %v1762_v53 }
 0x7c7   : > { %v1765_v57 = vmul.f32 0.5, %v1763_v54 }
 0x7c8   : > { %v1766_v58 = vmul.f32 %v1764_v55, %v1734_v37 }
 0x7c9   : > { %v1767_v59 = vmul.f32 %v1765_v57, %v1747_v38 }
 0x7ca   : > { %v1768_v60 = vpack.c.bf16 %v1766_v58, %v1766_v58 }
 0x7cb   : > { %v1769_v61 = vpack.c.bf16 %v1767_v59, %v1767_v59 }
 0x7cc   : > { %1910 = vmatmul.bf16.vlgmr.msrb.gmra.mxu0 %v1768_v60 }
 0x7cd   : > { %1923 = vmatmul.bf16.vlgmr.msra.gmra.mxu1 %v1769_v61 }
 0x849   : > { %v1911_v63 = vpop.f32.mrf.mxu0 }
 0x84a   : > { %v1912_v1 = vadd.f32 %v2962_v62, %v1911_v63  ;;  %v1924_v2 = vpop.f32.mrf.mxu1 }
 0x84c   : > { %v1925_v3 = vadd.f32 %v1924_v2, %v1912_v1 }
 0x84e   : > { %v1928_v4 = vadd.f32 %v1925_v3, %v4140_v15 }
 0x850   : > { %1929 = vadd.xlane.f32.xlu1 %v1928_v4 }
 0x851   : > { %v1913_v5 = vpop.f32.mrf.mxu0 }
 0x852   : > { %v1926_v6 = vpop.f32.mrf.mxu1 }
 0x8c3   : > { %v1930_v56 = vpop.xlane.xlu1 %1929 }
 0x8c4   : > { %v1931_v7 = vmul.f32 %v1930_v56, %v4097_v16 }
 0x8c6   : > { %v1932_v8 = vsub.f32 %v1928_v4, %v1931_v7 }
 0x8c8   : > { %v1933_v9 = vmul.f32 %v1932_v8, %v1932_v8 }
 0x8ca   : > { %1934 = vadd.xlane.f32.xlu2 %v1933_v9 }
 0x93d   : > { %v1935_v10 = vpop.xlane.xlu2 %1934 }
 0x93e   : > { %v1936_v11 = vmul.f32 %v1935_v10, %v4097_v16  ;;  %v2964_v16 = vld [vmem:[%s1028_s16] ss:$0 sm:$0xff] }
 0x940   : > { %v1937_v12 = vadd.f32 1e-05, %v1936_v11 }
 0x942   : > { %2989 = vrsqrt.f32 %v1937_v12  ;;  %vm1944_vm10 = vweird.f32 %v1937_v12 }
 0x948   : > { %v2990_v13 = vpop.eup %2989 }
 0x949   : > { %v1939_v14 = vmul.f32 %v2990_v13, %v1937_v12  ;;  %vm1945_vm9 = vweird.f32 %v2990_v13 }
 0x94a   : > { %vm1946_vm11 = vmor %vm1944_vm10, %vm1945_vm9 }
 0x94b   : > { %v1940_v0 = vmul.f32 %v2990_v13, %v1939_v14 }
 0x94d   : > { %v1941_v15 = vmul.f32 0.5, %v1940_v0 }
 0x94f   : > { %v1942_v17 = vsub.f32 1.5, %v1941_v15 }
 0x951   : > { %v1943_v18 = vmul.f32 %v2990_v13, %v1942_v17 }
 0x953   : > { %v1947_v19 = vsel %vm1946_vm11, %v2990_v13, %v1943_v18 }
 0x954   : > { %v1948_v21 = vmul.f32 %v1947_v19, %v1932_v8 }
 0x956   : > { %v1953_v22 = vmul.f32 %v2963_v20, %v1948_v21  ;;  %1963 = sbr.rel (%p2703_p4) target bundleno = 2586 (0xa1a), region = 140 }
 0x958   : > { %v1958_v23 = vadd.f32 %v2964_v16, %v1953_v22 }
 0x95a   : > { %1959 = vst [vmem:[#allocation2] sm:$0xff] %v1958_v23 }
 0x95b   : > { %v1993_v24 = vld [vmem:[#allocation18 + $0x70] sm:$0xff]  ;;  %v1994_v25 = vld [vmem:[#allocation18 + $0x78] sm:$0xff]  ;;  %v1991_v26 = vld [vmem:[#allocation18 + $0x60] sm:$0xff]  ;;  %v3519_v29 = vmov 8.0   ;;  %v1964_v30 = vrot.slane %v1958_v23, 4  ;;  %v2036_v11 = vlaneseq }
 0x95c   : > { %v2002_v27 = vpack.c.bf16 %v1994_v25, %v1993_v24  ;;  %v1992_v28 = vld [vmem:[#allocation18 + $0x68] sm:$0xff]  ;;  %2991 = vrcp.f32 %v3519_v29  ;;  %v1989_v32 = vld [vmem:[#allocation18 + $0x50] sm:$0xff]  ;;  %v1990_v33 = vld [vmem:[#allocation18 + $0x58] sm:$0xff] }
 0x95d   : > { %v2001_v31 = vpack.c.bf16 %v1992_v28, %v1991_v26  ;;  %v1965_v34 = vadd.f32 %v1964_v30, %v1958_v23  ;;  %v2000_v36 = vpack.c.bf16 %v1990_v33, %v1989_v32  ;;  %v1987_v37 = vld [vmem:[#allocation18 + $0x40] sm:$0xff]  ;;  %v1988_v38 = vld [vmem:[#allocation18 + $0x48] sm:$0xff]  ;;  %v1985_v43 = vld [vmem:[#allocation18 + $0x30] sm:$0xff]  ;;  %v2037_v15 = vand.u32 127, %v2036_v11 }
 0x95e   : > { %2004 = vmatpush.bf16.msra.mxu0 %v2002_v27  ;;  %v1999_v41 = vpack.c.bf16 %v1988_v38, %v1987_v37  ;;  %v1986_v44 = vld [vmem:[#allocation18 + $0x38] sm:$0xff]  ;;  %v1983_v48 = vld [vmem:[#allocation18 + $0x20] sm:$0xff]  ;;  %v1984_v49 = vld [vmem:[#allocation18 + $0x28] sm:$0xff] }
 0x95f   : > { %v1966_v40 = vrot.slane %v1965_v34, 2  ;;  %v1998_v46 = vpack.c.bf16 %v1986_v44, %v1985_v43  ;;  %v1997_v51 = vpack.c.bf16 %v1984_v49, %v1983_v48  ;;  %v1981_v53 = vld [vmem:[#allocation18 + $0x10] sm:$0xff]  ;;  %v1982_v54 = vld [vmem:[#allocation18 + $0x18] sm:$0xff]  ;;  %v1979_v59 = vld [vmem:[#allocation18] sm:$0xff]  ;;  %vm2038_vm14 = vcmp.lt.s32.totalorder %v2037_v15, 7 }
 0x960   : > { %v1996_v57 = vpack.c.bf16 %v1982_v54, %v1981_v53  ;;  %v1980_v60 = vld [vmem:[#allocation18 + $0x8] sm:$0xff]  ;;  %v2003_v1 = vld [vmem:[#allocation20] sm:$0x1]  ;;  %v2018_v10 = vld [vmem:[%s1031_s11] sm:$0x1] }
 0x961   : > { %v1967_v45 = vadd.f32 %v1966_v40, %v1965_v34  ;;  %v1995_v62 = vpack.c.bf16 %v1980_v60, %v1979_v59 }
 0x962   : > { %v2992_v35 = vpop.eup %2991  ;;  %2005 = vmatpush.bf16.msra.mxu0 %v2001_v31 }
 0x963   : > { %v1971_v39 = vmul.f32 8.0, %v2992_v35  ;;  %v1968_v50 = vrot.slane %v1967_v45, 1  ;;  %vm1975_vm12 = vweird.f32 %v2992_v35 }
 0x965   : > { %v1972_v42 = vsub.f32 1.0, %v1971_v39  ;;  %v1969_v55 = vadd.f32 %v1968_v50, %v1967_v45 }
 0x966   : > { %2006 = vmatpush.bf16.msra.mxu0 %v2000_v36 }
 0x967   : > { %v1973_v47 = vmul.f32 %v2992_v35, %v1972_v42 }
 0x969   : > { %v1974_v52 = vadd.f32 %v2992_v35, %v1973_v47 }
 0x96a   : > { %2007 = vmatpush.bf16.msra.mxu0 %v1999_v41 }
 0x96b   : > { %v1976_v58 = vsel %vm1975_vm12, %v2992_v35, %v1974_v52 }
 0x96c   : > { %v1977_v61 = vmul.f32 %v1976_v58, %v1969_v55 }
 0x96e   : > { %2008 = vmatpush.bf16.msra.mxu0 %v1998_v46  ;;  %v1978_v63 = vpack.c.bf16 %v1977_v61, %v1977_v61 }
 0x972   : > { %2009 = vmatpush.bf16.msra.mxu0 %v1997_v51 }
 0x976   : > { %2010 = vmatpush.bf16.msra.mxu0 %v1996_v57 }
 0x97a   : > { %2011 = vmatpush.bf16.msra.mxu0 %v1995_v62 }
 0x97d   : > { %2012 = vmatmul.bf16.vlgmr.msra.gmra.mxu0 %v1978_v63 }
 0x9fa   : > { %v2013_v2 = vpop.f32.mrf.mxu0 }
 0x9fb   : > { %v2014_v3 = vadd.f32 %v2013_v2, %v2003_v1 }
 0x9fd   : > { %2017 = vst [vmem:[%s1006_s14] sm:$0x1] %v2014_v3  ;;  %v2022_v4 = vand.u32 2147483647, %v2014_v3  ;;  %v2019_v13 = vmax.f32 %v2014_v3, 0.0  ;;  %v2020_v14 = vmul.f32 %v2018_v10, %v2014_v3 }
 0x9ff   : > { %v2023_v5 = vsub.f32 0.0, %v2022_v4  ;;  %v2021_v19 = vsub.f32 %v2019_v13, %v2020_v14 }
 0xa01   : > { %v2024_v6 = vmul.f32 1.442695, %v2023_v5 }
 0xa02   : > { %v2015_v56 = vpop.f32.mrf.mxu0 }
 0xa03   : > { %2993 = vpow2.f32 %v2024_v6 }
 0xa09   : > { %v2994_v7 = vpop.eup %2993 }
 0xa0a   : > { %v2026_v8 = vadd.f32 1.0, %v2994_v7  ;;  %v2029_v9 = vmul.f32 -0.5, %v2994_v7  ;;  %v2032_v0 = vand.u32 2147483647, %v2994_v7 }
 0xa0c   : > { %2995 = vlog2.f32 %v2026_v8  ;;  %v2030_v12 = vadd.f32 1.0, %v2029_v9  ;;  %vm2033_vm13 = vcmp.lt.f32.partialorder %v2032_v0, 0.0004427343 }
 0xa0e   : > { %v2031_v20 = vmul.f32 %v2994_v7, %v2030_v12 }
 0xa12   : > { %v2996_v17 = vpop.eup %2995 }
 0xa13   : > { %v2028_v18 = vmul.f32 0.6931472, %v2996_v17 }
 0xa15   : > { %v2034_v16 = vsel %vm2033_vm13, %v2031_v20, %v2028_v18 }
 0xa16   : > { %v2035_v21 = vadd.f32 %v2034_v16, %v2021_v19 }
 0xa18   : > { %v2039_v22 = vsel %vm2038_vm14, %v2035_v21, 0.0 }
 0xa19   : > { %2040 = vst [vmem:[%s1012_s29] sm:$0x1] %v2039_v22 }
 0xa1a PF: > { %s4408_s11 = sld [smem:[#allocation39_spill]]  ;;  %s2056_s21 = sshll.u32 %s1006_s14, 4  ;;  %s2057_s21 = int_to_ptr.vmem [resolvable:$true] %s2056_s21 }
 0xa1b   : > { %s4409_s4 = sld [smem:[#allocation70_spill]]  ;;  %s2042_s13 = scalar_lea.sflag [#allocation5], %s3891_s27 }
 0xa21   : > { %s2054_s0 = scalar_lea.hbm %s4409_s4, %s4408_s11  ;;  %s3347_s19 = scalar_lea.hbm %s4409_s4, 2 }
 0xa22   : > { %s2058_s22 = sshll.u32 %s2054_s0, 4  ;;  %s2059_s22 = int_to_ptr.hbm [resolvable:$true] %s2058_s22 }
 0xa23   : > { %s3341_s2 = sshra.s32 %s2059_s22, 4  ;;  %s3342_s2 = int_to_ptr.hbm [resolvable:$true] %s3341_s2 }
 0xa24   : > { %s3343_s3 = scalar_lea.hbm %s3342_s2, 1  ;;  %p3348_p0 = scmp.lt.s32.totalorder %s3342_s2, %s4409_s4 }
 0xa25   : > { %p3344_p6 = scmp.ne.s32.totalorder %s3342_s2, %s3343_s3  ;;  %p3349_p3 = scmp.lt.s32.totalorder %s3347_s19, %s3343_s3 }
 0xa27   : > { %p3345_p11 = pnand %p3344_p6, %p3760_p5  ;;  %p3350_p7 = por %p3349_p3, %p3348_p0 }
 0xa29   : > { %p3346_p8 = pneg %p3345_p11 }
 0xa2b   : > { %p3351_p9 = pnand %p3350_p7, %p3346_p8 }
 0xa2d   : > { %3354 = shalt.err (!%p3351_p9)
}
 0xa2e   : > { %2805 = dma.vmem_to_hbm [thread:$0]  (%p3760_p5), %s2057_s21, 16, %s2059_s22, %s2042_s13  }
 0xa2f   : > { %s4411_s8 = sld [smem:[#allocation71_spill]]  ;;  %s2069_s24 = sshll.u32 %s1012_s29, 4  ;;  %s2070_s24 = int_to_ptr.vmem [resolvable:$true] %s2069_s24 }
 0xa30   : > { %s2046_s20 = scalar_lea.sflag [#allocation23], %s3891_s27 }
 0xa35   : > { %s2067_s5 = scalar_lea.hbm %s4411_s8, %s4408_s11  ;;  %s3375_s18 = scalar_lea.hbm %s4411_s8, 2 }
 0xa36   : > { %s2071_s25 = sshll.u32 %s2067_s5, 4  ;;  %s2072_s25 = int_to_ptr.hbm [resolvable:$true] %s2071_s25 }
 0xa37   : > { %s3369_s9 = sshra.s32 %s2072_s25, 4  ;;  %s3370_s9 = int_to_ptr.hbm [resolvable:$true] %s3369_s9 }
 0xa38   : > { %s3371_s26 = scalar_lea.hbm %s3370_s9, 1  ;;  %p3376_p1 = scmp.lt.s32.totalorder %s3370_s9, %s4411_s8 }
 0xa39   : > { %p3372_p10 = scmp.ne.s32.totalorder %s3370_s9, %s3371_s26  ;;  %p3377_p4 = scmp.lt.s32.totalorder %s3375_s18, %s3371_s26 }
 0xa3b   : > { %p3373_p12 = pnand %p3372_p10, %p3760_p5  ;;  %p3378_p6 = por %p3377_p4, %p3376_p1 }
 0xa3d   : > { %p3374_p2 = pneg %p3373_p12 }
 0xa3f   : > { %p3379_p11 = pnand %p3378_p6, %p3374_p2 }
 0xa41   : > { %3382 = shalt.err (!%p3379_p11)
}
 0xa42   : > { %2806 = dma.vmem_to_hbm [thread:$0]  (%p3760_p5), %s2070_s24, 16, %s2072_s25, %s2046_s20  }
 0xa43 PF: > { %s4412_s27 = sld [smem:[#allocation42_spill]] }
 0xa44   : > { %s4413_s29 = sld [smem:[#allocation35_spill]] }
 0xa49   : > { %p2856_p8 = scmp.ge.s32.totalorder %s4412_s27, 2 }
 0xa4a   : > { %s2083_s6 = sand.u32 1, %s4413_s29  }
 0xa4b   : > { %p2845_p0 = pnand %p2856_p8, %p3770_p13  ;;  %s2084_s0 = scalar_lea.sflag [#allocation5], %s2083_s6 }
 0xa4d   : > { %p2846_p3 = pneg %p2845_p0 }
 0xa4f   : > { %3456 = dma.done.wait (%p2846_p3), %s2084_s0, 16  }
 0xa50   : > { %3458 = vsyncadd (%p2846_p3), %s2084_s0, 4294967280  ;;  %s2093_s21 = scalar_lea.sflag [#allocation23], %s2083_s6 }
 0xa51   : > { %3460 = dma.done.wait (%p2846_p3), %s2093_s21, 16  }
 0xa52   : > { %3462 = vsyncadd (%p2846_p3), %s2093_s21, 4294967280  ;;  %s51_s2 = sadd.s32 1, %s4412_s27   ;;  %s4415_s27 = sld [smem:[#allocation33_spill]] }
 0xa53   : > { %p48_p7 = scmp.ge.s32.totalorder %s51_s2, 6   ;;  %s4416_s28 = sld [smem:[#allocation34_spill]] }
 0xa54   : > { %s4417_s29 = sld [smem:[#allocation46_spill]] }
 0xa55   : > { %s4418_s30 = sld [smem:[#allocation36_spill]] }
 0xa56   : > { %s4419_s0 = sld [smem:[#allocation37_spill]] }
 0xa57   : > { %s4420_s19 = sld [smem:[#allocation47_spill]]  ;;  %50 = sbr.rel (!%p48_p7) target bundleno = 40 (0x28), region = 280 }
 0xa58   : > { %s4421_s1 = sld [smem:[#allocation40_spill]] }
 0xa59   : > { %s4422_s20 = sld [smem:[#allocation41_spill]] }
 0xa5a   : > { %s4423_s21 = sld [smem:[#allocation44_spill]] }
 0xa5b   : > { %s4424_s22 = sld [smem:[#allocation45_spill]] }
 0xa5c   :  { %2098 = vsyncpa [#allocation4], 1 }
 0xa5d   :  { %2100 = vsyncpa [#allocation4 + $0x1], 1 }
 0xa5e   :  { %2101 = vsyncpa [#allocation7], 1 }
 0xa5f   :  { %2103 = vsyncpa [#allocation7 + $0x1], 1 }
 0xa60   :  { %2104 = vsyncpa [#allocation10], 1 }
 0xa61   :  { %2106 = vsyncpa [#allocation10 + $0x1], 1 }
 0xa62   :  { %2107 = vsyncpa [#allocation13], 1 }
 0xa63   :  { %2109 = vsyncpa [#allocation13 + $0x1], 1 }
 0xa64   :  { %2110 = vsyncpa [#allocation16], 1 }
 0xa65   :  { %2112 = vsyncpa [#allocation16 + $0x1], 1 }
 0xa66   :  { %2113 = vsyncpa [#allocation19], 1 }
 0xa67   :  { %2114 = vsyncpa [#allocation5], 1 }
 0xa68   :  { %2116 = vsyncpa [#allocation5 + $0x1], 1 }
 0xa69   :  { %2117 = vsyncpa [#allocation23], 1 }
 0xa6a   :  { %2119 = vsyncpa [#allocation23 + $0x1], 1 }

</bundles_post_ra>
